<compile_context>
chip_gen: v5e
topology: v5e:2x2
jax: 0.10.0
libtpu: 0.0.40
codegen_flags: <defaults>
</compile_context>

<pallas_src>
import functools
import math

import jax
import jax.numpy as jnp
from jax.experimental import pallas as pl
from jax.experimental.pallas import tpu as pltpu

# Small BERT-like config (bert-base has hidden=768, 12 layers, 12 heads; same
# structure at toy sizes).
CFG = dict(vocab_size=128, hidden=32, num_heads=4, num_layers=2,
           intermediate=64, max_pos=16, type_vocab=2, num_labels=2,
           ln_eps=1e-12)

# 48 MiB scoped VMEM: > v5e/v6e defaults, < v7x's 64 MiB physical (headroom for
# Mosaic internal scratch).  On v5e/v6e (128 MiB physical) this could be raised
# to 64-96 MiB with larger tiles; keep the conservative value so one config is
# safe on all three generations.
VMEM_LIMIT = 48 * 1024 * 1024

# Preferred tile sizes (bf16).  Double-buffered footprint at full size:
# 2*(tm*tk + tk*tn + tm*tn)*2B + tm*tn*4B  <<  VMEM_LIMIT.
TM_PREF, TN_PREF, TK_PREF = 256, 256, 512
LANE = 128  # MXU/vreg-native tile multiple


def _pick(dim, pref, prefer_split=False):
    """Largest 128-aligned divisor of `dim` that is <= pref (full dim if none).

    With prefer_split=True the tile is additionally capped at dim//2 when that
    is possible, so 'parallel' grid axes get >= 2 blocks (v7x has 2 TCs).
    """
    cap = pref
    if prefer_split and dim % (2 * LANE) == 0:
        cap = min(pref, dim // 2)
    if dim <= cap:
        return dim
    t = (cap // LANE) * LANE
    while t >= LANE:
        if dim % t == 0:
            return t
        t -= LANE
    return dim  # no aligned divisor; fall back to the full dim


# ------------------------------ Pallas kernels -------------------------------

def _linear_kernel(x_ref, w_ref, b_ref, o_ref, acc_ref, *, act):
    """Tiled y = x @ w; bias (+ optional GELU) applied at the last k step."""
    @pl.when(pl.program_id(2) == 0)
    def _():
        acc_ref[...] = jnp.zeros_like(acc_ref)

    acc_ref[...] += jnp.dot(x_ref[...], w_ref[...],
                            preferred_element_type=jnp.float32)

    @pl.when(pl.program_id(2) == pl.num_programs(2) - 1)
    def _():
        y = acc_ref[...] + b_ref[...]          # bias (1, tn) broadcasts over rows
        if act == "gelu":
            # TODO(synk): exact erf-GELU (HF default) vs tanh approximation.
            c = math.sqrt(2.0 / math.pi)
            y = 0.5 * y * (1.0 + jnp.tanh(c * (y + 0.044715 * y * y * y)))
        o_ref[...] = y.astype(o_ref.dtype)


def linear(x, w, b, act="none"):
    """y = x @ w + b (w stored [in, out], bf16), optional fused GELU.  bf16 out."""
    M, K = x.shape
    _, N = w.shape
    tm = _pick(M, TM_PREF, prefer_split=True)
    tn = _pick(N, TN_PREF)
    tk = _pick(K, TK_PREF)
    cost = pl.CostEstimate(
        flops=2 * M * N * K,
        transcendentals=(M * N if act == "gelu" else 0),
        bytes_accessed=(x.size * x.dtype.itemsize + w.size * w.dtype.itemsize
                        + N * 4 + M * N * 2))
    return pl.pallas_call(
        functools.partial(_linear_kernel, act=act),
        out_shape=jax.ShapeDtypeStruct((M, N), jnp.bfloat16),
        grid_spec=pltpu.PrefetchScalarGridSpec(
            num_scalar_prefetch=0,
            grid=(M // tm, N // tn, K // tk),
            in_specs=[pl.BlockSpec((tm, tk), lambda i, j, k: (i, k)),
                      pl.BlockSpec((tk, tn), lambda i, j, k: (k, j)),
                      pl.BlockSpec((1, tn), lambda i, j, k: (0, j))],
            out_specs=pl.BlockSpec((tm, tn), lambda i, j, k: (i, j)),
            scratch_shapes=[pltpu.VMEM((tm, tn), jnp.float32)]),
        compiler_params=pltpu.CompilerParams(
            dimension_semantics=("parallel", "parallel", "arbitrary"),
            vmem_limit_bytes=VMEM_LIMIT),
        cost_estimate=cost,
    )(x, w, b.reshape(1, N).astype(jnp.float32))


def _linear_res_ln_kernel(x_ref, w_ref, b_ref, r_ref, g_ref, be_ref,
                          o_ref, acc_ref, *, eps):
    """Tiled y = LayerNorm(x @ w + b + residual); LN fused in the epilogue.

    The full output row (N = hidden) lives in one block so mean/var are exact.
    All statistics in f32; output cast to bf16.
    """
    @pl.when(pl.program_id(1) == 0)
    def _():
        acc_ref[...] = jnp.zeros_like(acc_ref)

    acc_ref[...] += jnp.dot(x_ref[...], w_ref[...],
                            preferred_element_type=jnp.float32)

    @pl.when(pl.program_id(1) == pl.num_programs(1) - 1)
    def _():
        y = acc_ref[...] + b_ref[...] + r_ref[...].astype(jnp.float32)
        mu = jnp.mean(y, axis=-1, keepdims=True)
        var = jnp.mean(jnp.square(y - mu), axis=-1, keepdims=True)
        y = (y - mu) * jax.lax.rsqrt(var + eps)
        o_ref[...] = (y * g_ref[...] + be_ref[...]).astype(o_ref.dtype)


def linear_res_ln(x, w, b, residual, gamma, beta, eps=CFG["ln_eps"]):
    M, K = x.shape
    _, N = w.shape
    tm = _pick(M, TM_PREF, prefer_split=True)
    tk = _pick(K, TK_PREF)
    cost = pl.CostEstimate(
        flops=2 * M * N * K + 10 * M * N,
        transcendentals=0,
        bytes_accessed=(x.size * x.dtype.itemsize + w.size * w.dtype.itemsize
                        + residual.size * residual.dtype.itemsize
                        + 3 * N * 4 + M * N * 2))
    return pl.pallas_call(
        functools.partial(_linear_res_ln_kernel, eps=eps),
        out_shape=jax.ShapeDtypeStruct((M, N), jnp.bfloat16),
        grid_spec=pltpu.PrefetchScalarGridSpec(
            num_scalar_prefetch=0,
            grid=(M // tm, K // tk),
            in_specs=[pl.BlockSpec((tm, tk), lambda i, k: (i, k)),
                      pl.BlockSpec((tk, N), lambda i, k: (k, 0)),
                      pl.BlockSpec((1, N), lambda i, k: (0, 0)),
                      pl.BlockSpec((tm, N), lambda i, k: (i, 0)),
                      pl.BlockSpec((1, N), lambda i, k: (0, 0)),
                      pl.BlockSpec((1, N), lambda i, k: (0, 0))],
            out_specs=pl.BlockSpec((tm, N), lambda i, k: (i, 0)),
            scratch_shapes=[pltpu.VMEM((tm, N), jnp.float32)]),
        compiler_params=pltpu.CompilerParams(
            dimension_semantics=("parallel", "arbitrary"),
            vmem_limit_bytes=VMEM_LIMIT),
        cost_estimate=cost,
    )(x, w, b.reshape(1, N).astype(jnp.float32), residual,
      gamma.reshape(1, N).astype(jnp.float32),
      beta.reshape(1, N).astype(jnp.float32))


def _emb_ln_kernel(w_ref, t_ref, p_ref, g_ref, b_ref, o_ref, *, eps):
    """Fused embedding sum (word + token-type + position) + LayerNorm, per batch."""
    x = (w_ref[0].astype(jnp.float32) + t_ref[0].astype(jnp.float32)
         + p_ref[...].astype(jnp.float32))
    mu = jnp.mean(x, axis=-1, keepdims=True)
    var = jnp.mean(jnp.square(x - mu), axis=-1, keepdims=True)
    y = (x - mu) * jax.lax.rsqrt(var + eps)
    o_ref[0] = (y * g_ref[...] + b_ref[...]).astype(o_ref.dtype)


def emb_layernorm(word, typ, pos, gamma, beta, eps=CFG["ln_eps"]):
    """word/typ: [B, S, H] bf16 (gathered), pos: [S, H] bf16 -> LN(sum) bf16."""
    B, S, H = word.shape
    return pl.pallas_call(
        functools.partial(_emb_ln_kernel, eps=eps),
        out_shape=jax.ShapeDtypeStruct((B, S, H), jnp.bfloat16),
        grid_spec=pltpu.PrefetchScalarGridSpec(
            num_scalar_prefetch=0,
            grid=(B,),
            in_specs=[pl.BlockSpec((1, S, H), lambda b: (b, 0, 0)),
                      pl.BlockSpec((1, S, H), lambda b: (b, 0, 0)),
                      pl.BlockSpec((S, H), lambda b: (0, 0)),
                      pl.BlockSpec((1, H), lambda b: (0, 0)),
                      pl.BlockSpec((1, H), lambda b: (0, 0))],
            out_specs=pl.BlockSpec((1, S, H), lambda b: (b, 0, 0))),
        compiler_params=pltpu.CompilerParams(
            dimension_semantics=("parallel",),
            vmem_limit_bytes=VMEM_LIMIT),
    )(word, typ, pos,
      gamma.reshape(1, H).astype(jnp.float32),
      beta.reshape(1, H).astype(jnp.float32))


def _attn_block_kernel(qkv_ref, m_ref, aow_ref, aob_ref, res_ref, g_ref, be_ref,
                       o_ref, ctx_ref, *, num_heads, head_dim, eps):
    """Per-batch fused: multi-head attention + output projection + residual + LN.

    qkv block: (1, S, 3H) bf16 (Q columns pre-scaled by 1/sqrt(HD) at init).
    mask block: (1, 1, S) int32 (additive -10000 term computed in-kernel).
    Each head's output is streamed into the (S, H) f32 ctx scratch at its lane
    offset as soon as it is computed (bounded live ranges); then a single
    ctx @ ao_w MXU matmul, bias + residual add and LayerNorm, and one
    lane-dense bf16 store.  Softmax/LN stats in f32; MXU inputs bf16.
    """
    H = num_heads * head_dim
    qkv = qkv_ref[0]                                              # (S, 3H) bf16
    add_mask = (1.0 - m_ref[0].astype(jnp.float32)) * -10000.0    # (1, S)

    # TODO(synk): at real head_dim/seq lengths move heads onto the grid (or a
    # flash-style (B, NH, tq, tk) grid) to avoid per-head lane slicing of qkv.
    for h in range(num_heads):
        qh = qkv[:, h * head_dim:(h + 1) * head_dim]
        kh = qkv[:, H + h * head_dim:H + (h + 1) * head_dim]
        vh = qkv[:, 2 * H + h * head_dim:2 * H + (h + 1) * head_dim]
        s = jax.lax.dot_general(qh, kh, (((1,), (1,)), ((), ())),
                                preferred_element_type=jnp.float32)
        s = s + add_mask
        mx = jnp.max(s, axis=-1, keepdims=True)
        p = jnp.exp(s - mx)
        denom = jnp.sum(p, axis=-1, keepdims=True)
        p = (p * pl.reciprocal(denom, approx=True)).astype(qkv.dtype)
        # Immediate per-head store into scratch -> no deferred concatenate.
        ctx_ref[:, h * head_dim:(h + 1) * head_dim] = jnp.dot(
            p, vh, preferred_element_type=jnp.float32)

    # Attention output projection + bias + residual + LayerNorm, all fused.
    ctx = ctx_ref[...].astype(jnp.bfloat16)
    y = jnp.dot(ctx, aow_ref[...], preferred_element_type=jnp.float32)
    y = y + aob_ref[...] + res_ref[0].astype(jnp.float32)
    mu = jnp.mean(y, axis=-1, keepdims=True)
    var = jnp.mean(jnp.square(y - mu), axis=-1, keepdims=True)
    y = (y - mu) * jax.lax.rsqrt(var + eps)
    o_ref[0] = (y * g_ref[...] + be_ref[...]).astype(o_ref.dtype)


def attention_block(qkv, mask, ao_w, ao_b, residual, gamma, beta,
                    num_heads, head_dim, eps=CFG["ln_eps"]):
    """qkv: [B, S, 3H] bf16; mask: [B, 1, S] int32 (1 = keep); residual: [B, S, H].

    Returns LayerNorm(attention(qkv) @ ao_w + ao_b + residual) as [B, S, H] bf16.
    """
    B, S, H3 = qkv.shape
    H = H3 // 3
    cost = pl.CostEstimate(
        flops=4 * B * num_heads * S * S * head_dim + 2 * B * S * H * H
              + 10 * B * S * H,
        transcendentals=B * num_heads * S * S,
        bytes_accessed=(qkv.size * 2 + mask.size * 4 + ao_w.size * 2
                        + residual.size * 2 + B * S * H * 2 + 3 * H * 4))
    return pl.pallas_call(
        functools.partial(_attn_block_kernel, num_heads=num_heads,
                          head_dim=head_dim, eps=eps),
        out_shape=jax.ShapeDtypeStruct((B, S, H), jnp.bfloat16),
        grid_spec=pltpu.PrefetchScalarGridSpec(
            num_scalar_prefetch=0,
            grid=(B,),
            in_specs=[pl.BlockSpec((1, S, H3), lambda b: (b, 0, 0)),
                      pl.BlockSpec((1, 1, S), lambda b: (b, 0, 0)),
                      pl.BlockSpec((H, H), lambda b: (0, 0)),
                      pl.BlockSpec((1, H), lambda b: (0, 0)),
                      pl.BlockSpec((1, S, H), lambda b: (b, 0, 0)),
                      pl.BlockSpec((1, H), lambda b: (0, 0)),
                      pl.BlockSpec((1, H), lambda b: (0, 0))],
            out_specs=pl.BlockSpec((1, S, H), lambda b: (b, 0, 0)),
            scratch_shapes=[pltpu.VMEM((S, H), jnp.float32)]),
        compiler_params=pltpu.CompilerParams(
            dimension_semantics=("parallel",),
            vmem_limit_bytes=VMEM_LIMIT),
        cost_estimate=cost,
    )(qkv, mask, ao_w,
      ao_b.reshape(1, H).astype(jnp.float32), residual,
      gamma.reshape(1, H).astype(jnp.float32),
      beta.reshape(1, H).astype(jnp.float32))


# ------------------------------ Parameters -----------------------------------

def init_params(key):
    H, I = CFG["hidden"], CFG["intermediate"]
    HD = H // CFG["num_heads"]
    scale = 1.0 / math.sqrt(HD)
    keys = iter(jax.random.split(key, 64))

    def dense(kin, kout):
        # Matmul weights stored in bf16 (MXU inputs); biases / LN params in f32.
        return (0.02 * jax.random.normal(next(keys), (kin, kout),
                                         jnp.float32)).astype(jnp.bfloat16)

    def bias(n):
        return jnp.zeros((n,), jnp.float32)

    def emb(rows):
        return (0.02 * jax.random.normal(next(keys), (rows, H),
                                         jnp.float32)).astype(jnp.bfloat16)

    params = dict(
        word_emb=emb(CFG["vocab_size"]),
        pos_emb=emb(CFG["max_pos"]),
        type_emb=emb(CFG["type_vocab"]),
        emb_ln_g=jnp.ones((H,), jnp.float32), emb_ln_b=jnp.zeros((H,), jnp.float32),
        layers=[],
        # Pooler / classifier are tiny -> plain XLA, keep f32.
        pool_w=0.02 * jax.random.normal(next(keys), (H, H), jnp.float32), pool_b=bias(H),
        cls_w=0.02 * jax.random.normal(next(keys), (H, CFG["num_labels"]), jnp.float32),
        cls_b=bias(CFG["num_labels"]),
    )
    for _ in range(CFG["num_layers"]):
        q_w, k_w, v_w = dense(H, H), dense(H, H), dense(H, H)
        q_b, k_b, v_b = bias(H), bias(H), bias(H)
        params["layers"].append(dict(
            # Fused [H, 3H] QKV weight; 1/sqrt(head_dim) folded into Q cols+bias.
            qkv_w=jnp.concatenate([(q_w.astype(jnp.float32) * scale).astype(jnp.bfloat16),
                                   k_w, v_w], axis=1),
            qkv_b=jnp.concatenate([q_b * scale, k_b, v_b]),
            ao_w=dense(H, H), ao_b=bias(H),
            attn_ln_g=jnp.ones((H,), jnp.float32), attn_ln_b=jnp.zeros((H,), jnp.float32),
            i_w=dense(H, I), i_b=bias(I),
            o_w=dense(I, H), o_b=bias(H),
            out_ln_g=jnp.ones((H,), jnp.float32), out_ln_b=jnp.zeros((H,), jnp.float32),
        ))
    return params


# ------------------------------ Forward pass ----------------------------------

def bert_forward(params, input_ids, token_type_ids, attention_mask):
    """Returns classification logits [B, num_labels] (eval mode: dropout = identity)."""
    B, S = input_ids.shape
    H, NH = CFG["hidden"], CFG["num_heads"]
    HD = H // NH
    M = B * S

    # Embedding gathers are glue in plain JAX (bf16 tables); sum + LayerNorm fused.
    word = jnp.take(params["word_emb"], input_ids, axis=0)        # [B, S, H] bf16
    typ = jnp.take(params["type_emb"], token_type_ids, axis=0)    # [B, S, H] bf16
    pos = params["pos_emb"][:S]                                   # [S, H]    bf16
    x = emb_layernorm(word, typ, pos, params["emb_ln_g"], params["emb_ln_b"])

    # Per-batch int mask (NOT replicated per head); additive term built in-kernel.
    mask3 = attention_mask.astype(jnp.int32).reshape(B, 1, S)

    for lyr in params["layers"]:
        # --- self attention (fused QKV matmul, then attn+proj+residual+LN) ---
        qkv = linear(x.reshape(M, H), lyr["qkv_w"], lyr["qkv_b"])   # [M, 3H]
        x = attention_block(qkv.reshape(B, S, 3 * H), mask3,
                            lyr["ao_w"], lyr["ao_b"], x,
                            lyr["attn_ln_g"], lyr["attn_ln_b"],
                            num_heads=NH, head_dim=HD)              # [B, S, H]
        # --- feed-forward ---
        xf = x.reshape(M, H)
        inter = linear(xf, lyr["i_w"], lyr["i_b"], act="gelu")
        xf = linear_res_ln(inter, lyr["o_w"], lyr["o_b"],
                           xf, lyr["out_ln_g"], lyr["out_ln_b"])
        x = xf.reshape(B, S, H)

    # Pooler ([CLS] -> dense -> tanh) + classifier: sub-vreg matmuls, leave to XLA.
    cls = x[:, 0, :].astype(jnp.float32)
    pooled = jnp.tanh(cls @ params["pool_w"] + params["pool_b"])
    logits = pooled @ params["cls_w"] + params["cls_b"]
    return logits


# ----------------------------------- Main -------------------------------------

if __name__ == "__main__":
    key = jax.random.PRNGKey(0)
    pkey, ikey = jax.random.split(key)
    params = init_params(pkey)

    B, S = 2, 8
    input_ids = jax.random.randint(ikey, (B, S), 0, CFG["vocab_size"], dtype=jnp.int32)
    token_type_ids = jnp.zeros((B, S), jnp.int32)
    attention_mask = jnp.ones((B, S), jnp.int32).at[1, 6:].set(0)  # pad tail of seq 1

    fwd = jax.jit(bert_forward)
    logits = fwd(params, input_ids, token_type_ids, attention_mask)
    logits = jax.block_until_ready(logits)
    assert logits.shape == (B, CFG["num_labels"])
    assert bool(jnp.all(jnp.isfinite(logits)))
    print("KERNEL_OK")
</pallas_src>

<mosaic_0001>
module attributes {stable_mosaic.version = 11 : i64} {
  func.func @_linear_kernel(%arg0: i32, %arg1: i32, %arg2: i32, %arg3: memref<16x32xbf16, #tpu.memory_space<vmem>>, %arg4: memref<32x96xbf16, #tpu.memory_space<vmem>>, %arg5: memref<1x96xf32, #tpu.memory_space<vmem>>, %arg6: memref<16x96xbf16, #tpu.memory_space<vmem>>, %arg7: memref<16x96xf32, #tpu.memory_space<vmem>>) attributes {dimension_semantics = [#tpu.dimension_semantics<parallel>, #tpu.dimension_semantics<parallel>, #tpu.dimension_semantics<arbitrary>], iteration_bounds = array<i64: 1, 1, 1>, scalar_prefetch = 0 : i64, scratch_operands = 1 : i64, tpu.core_type = #tpu.core_type<tc>, window_params = [{transform_indices = @transform_0, window_bounds = array<i64: 16, 32>}, {transform_indices = @transform_1, window_bounds = array<i64: 32, 96>}, {transform_indices = @transform_2, window_bounds = array<i64: 1, 96>}, {transform_indices = @transform_3, window_bounds = array<i64: 16, 96>}]} {
    %c0_i32 = arith.constant 0 : i32
    %0 = arith.cmpi eq, %arg2, %c0_i32 : i32
    %1 = arith.extui %0 : i1 to i32
    %c0_i32_0 = arith.constant 0 : i32
    %2 = arith.cmpi ne, %1, %c0_i32_0 : i32
    scf.if %2 {
      %cst_10 = arith.constant 0.000000e+00 : f32
      %12 = vector.broadcast %cst_10 : f32 to vector<16x96xf32>
      %c0_11 = arith.constant 0 : index
      %c0_12 = arith.constant 0 : index
      %13 = vector.load %arg7[%c0_11, %c0_12] : memref<16x96xf32, #tpu.memory_space<vmem>>, vector<16x96xf32>
      tpu.vector_store %arg7[%c0_11, %c0_12], %12 {strides = array<i32>} : memref<16x96xf32, #tpu.memory_space<vmem>>, vector<16x96xf32>,
    } else {
    }
    %c0 = arith.constant 0 : index
    %c0_1 = arith.constant 0 : index
    %3 = vector.load %arg7[%c0, %c0_1] : memref<16x96xf32, #tpu.memory_space<vmem>>, vector<16x96xf32>
    %c0_2 = arith.constant 0 : index
    %c0_3 = arith.constant 0 : index
    %4 = vector.load %arg3[%c0_2, %c0_3] : memref<16x32xbf16, #tpu.memory_space<vmem>>, vector<16x32xbf16>
    %c0_4 = arith.constant 0 : index
    %c0_5 = arith.constant 0 : index
    %5 = vector.load %arg4[%c0_4, %c0_5] : memref<32x96xbf16, #tpu.memory_space<vmem>>, vector<32x96xbf16>
    %cst = arith.constant dense<0.000000e+00> : vector<16x96xf32>
    %6 = tpu.matmul %4, %5, %cst {dimension_numbers = #tpu.dot_dimension_numbers<[1], [0], [0], [1], [0, 0, 1, 1], [], []>} : vector<16x32xbf16>, vector<32x96xbf16>, vector<16x96xf32> -> vector<16x96xf32>
    %7 = arith.addf %3, %6 : vector<16x96xf32>
    %c0_6 = arith.constant 0 : index
    %c0_7 = arith.constant 0 : index
    %8 = vector.load %arg7[%c0_6, %c0_7] : memref<16x96xf32, #tpu.memory_space<vmem>>, vector<16x96xf32>
    tpu.vector_store %arg7[%c0_6, %c0_7], %7 {strides = array<i32>} : memref<16x96xf32, #tpu.memory_space<vmem>>, vector<16x96xf32>,
    %c0_i32_8 = arith.constant 0 : i32
    %9 = arith.cmpi eq, %arg2, %c0_i32_8 : i32
    %10 = arith.extui %9 : i1 to i32
    %c0_i32_9 = arith.constant 0 : i32
    %11 = arith.cmpi ne, %10, %c0_i32_9 : i32
    scf.if %11 {
      %c0_10 = arith.constant 0 : index
      %c0_11 = arith.constant 0 : index
      %12 = vector.load %arg7[%c0_10, %c0_11] : memref<16x96xf32, #tpu.memory_space<vmem>>, vector<16x96xf32>
      %c0_12 = arith.constant 0 : index
      %c0_13 = arith.constant 0 : index
      %13 = vector.load %arg5[%c0_12, %c0_13] : memref<1x96xf32, #tpu.memory_space<vmem>>, vector<1x96xf32>
      %14 = vector.broadcast %13 : vector<1x96xf32> to vector<16x96xf32>
      %15 = arith.addf %12, %14 : vector<16x96xf32>
      %16 = arith.truncf %15 : vector<16x96xf32> to vector<16x96xbf16>
      %c0_14 = arith.constant 0 : index
      %c0_15 = arith.constant 0 : index
      %17 = vector.load %arg6[%c0_14, %c0_15] : memref<16x96xbf16, #tpu.memory_space<vmem>>, vector<16x96xbf16>
      tpu.vector_store %arg6[%c0_14, %c0_15], %16 {strides = array<i32>} : memref<16x96xbf16, #tpu.memory_space<vmem>>, vector<16x96xbf16>,
    } else {
    }
    return
  }
  func.func @transform_0(%arg0: i32, %arg1: i32, %arg2: i32) -> (i32, i32) {
    %c0_i32 = arith.constant 0 : i32
    return %arg0, %arg2 : i32, i32
  }
  func.func @transform_1(%arg0: i32, %arg1: i32, %arg2: i32) -> (i32, i32) {
    %c0_i32 = arith.constant 0 : i32
    return %arg2, %arg1 : i32, i32
  }
  func.func @transform_2(%arg0: i32, %arg1: i32, %arg2: i32) -> (i32, i32) {
    %c0_i32 = arith.constant 0 : i32
    %c0_i32_0 = arith.constant 0 : i32
    return %c0_i32, %arg1 : i32, i32
  }
  func.func @transform_3(%arg0: i32, %arg1: i32, %arg2: i32) -> (i32, i32) {
    %c0_i32 = arith.constant 0 : i32
    return %arg0, %arg1 : i32, i32
  }
}

module attributes {stable_mosaic.version = 11 : i64} {
  func.func @_emb_ln_kernel(%arg0: i32, %arg1: memref<1x8x32xbf16, #tpu.memory_space<vmem>>, %arg2: memref<1x8x32xbf16, #tpu.memory_space<vmem>>, %arg3: memref<8x32xbf16, #tpu.memory_space<vmem>>, %arg4: memref<1x32xf32, #tpu.memory_space<vmem>>, %arg5: memref<1x32xf32, #tpu.memory_space<vmem>>, %arg6: memref<1x8x32xbf16, #tpu.memory_space<vmem>>) attributes {dimension_semantics = [#tpu.dimension_semantics<parallel>], iteration_bounds = array<i64: 2>, scalar_prefetch = 0 : i64, scratch_operands = 0 : i64, tpu.core_type = #tpu.core_type<tc>, window_params = [{transform_indices = @transform_0, window_bounds = array<i64: 1, 8, 32>}, {transform_indices = @transform_1, window_bounds = array<i64: 1, 8, 32>}, {pipeline_mode = #tpu.pipeline_mode<synchronous>, transform_indices = @transform_2, window_bounds = array<i64: 8, 32>}, {pipeline_mode = #tpu.pipeline_mode<synchronous>, transform_indices = @transform_3, window_bounds = array<i64: 1, 32>}, {pipeline_mode = #tpu.pipeline_mode<synchronous>, transform_indices = @transform_4, window_bounds = array<i64: 1, 32>}, {transform_indices = @transform_5, window_bounds = array<i64: 1, 8, 32>}]} {
    %c0 = arith.constant 0 : index
    %c0_0 = arith.constant 0 : index
    %c0_1 = arith.constant 0 : index
    %0 = vector.load %arg1[%c0, %c0_0, %c0_1] : memref<1x8x32xbf16, #tpu.memory_space<vmem>>, vector<1x8x32xbf16>
    %1 = vector.shape_cast %0 : vector<1x8x32xbf16> to vector<8x32xbf16>
    %2 = arith.extf %1 : vector<8x32xbf16> to vector<8x32xf32>
    %c0_2 = arith.constant 0 : index
    %c0_3 = arith.constant 0 : index
    %c0_4 = arith.constant 0 : index
    %3 = vector.load %arg2[%c0_2, %c0_3, %c0_4] : memref<1x8x32xbf16, #tpu.memory_space<vmem>>, vector<1x8x32xbf16>
    %4 = vector.shape_cast %3 : vector<1x8x32xbf16> to vector<8x32xbf16>
    %5 = arith.extf %4 : vector<8x32xbf16> to vector<8x32xf32>
    %6 = arith.addf %2, %5 : vector<8x32xf32>
    %c0_5 = arith.constant 0 : index
    %c0_6 = arith.constant 0 : index
    %7 = vector.load %arg3[%c0_5, %c0_6] : memref<8x32xbf16, #tpu.memory_space<vmem>>, vector<8x32xbf16>
    %8 = arith.extf %7 : vector<8x32xbf16> to vector<8x32xf32>
    %9 = arith.addf %6, %8 : vector<8x32xf32>
    %cst = arith.constant dense<0.000000e+00> : vector<8xf32>
    %10 = vector.multi_reduction <add>, %9, %cst [1] : vector<8x32xf32> to vector<8xf32>
    %11 = vector.shape_cast %10 : vector<8xf32> to vector<8x1xf32>
    %cst_7 = arith.constant 3.200000e+01 : f32
    %12 = vector.broadcast %cst_7 : f32 to vector<8x1xf32>
    %13 = arith.divf %11, %12 : vector<8x1xf32>
    %14 = vector.broadcast %13 : vector<8x1xf32> to vector<8x32xf32>
    %15 = arith.subf %9, %14 : vector<8x32xf32>
    %16 = arith.mulf %15, %15 : vector<8x32xf32>
    %cst_8 = arith.constant dense<0.000000e+00> : vector<8xf32>
    %17 = vector.multi_reduction <add>, %16, %cst_8 [1] : vector<8x32xf32> to vector<8xf32>
    %18 = vector.shape_cast %17 : vector<8xf32> to vector<8x1xf32>
    %cst_9 = arith.constant 3.200000e+01 : f32
    %19 = vector.broadcast %cst_9 : f32 to vector<8x1xf32>
    %20 = arith.divf %18, %19 : vector<8x1xf32>
    %21 = vector.broadcast %13 : vector<8x1xf32> to vector<8x32xf32>
    %22 = arith.subf %9, %21 : vector<8x32xf32>
    %cst_10 = arith.constant 9.99999996E-13 : f32
    %23 = vector.broadcast %cst_10 : f32 to vector<8x1xf32>
    %24 = arith.addf %20, %23 : vector<8x1xf32>
    %25 = math.rsqrt %24 : vector<8x1xf32>
    %26 = vector.broadcast %25 : vector<8x1xf32> to vector<8x32xf32>
    %27 = arith.mulf %22, %26 : vector<8x32xf32>
    %c0_11 = arith.constant 0 : index
    %c0_12 = arith.constant 0 : index
    %28 = vector.load %arg4[%c0_11, %c0_12] : memref<1x32xf32, #tpu.memory_space<vmem>>, vector<1x32xf32>
    %29 = vector.broadcast %28 : vector<1x32xf32> to vector<8x32xf32>
    %30 = arith.mulf %27, %29 : vector<8x32xf32>
    %c0_13 = arith.constant 0 : index
    %c0_14 = arith.constant 0 : index
    %31 = vector.load %arg5[%c0_13, %c0_14] : memref<1x32xf32, #tpu.memory_space<vmem>>, vector<1x32xf32>
    %32 = vector.broadcast %31 : vector<1x32xf32> to vector<8x32xf32>
    %33 = arith.addf %30, %32 : vector<8x32xf32>
    %34 = arith.truncf %33 : vector<8x32xf32> to vector<8x32xbf16>
    %c0_15 = arith.constant 0 : index
    %c0_16 = arith.constant 0 : index
    %c0_17 = arith.constant 0 : index
    %35 = vector.load %arg6[%c0_15, %c0_16, %c0_17] : memref<1x8x32xbf16, #tpu.memory_space<vmem>>, vector<1x8x32xbf16>
    %36 = vector.shape_cast %35 : vector<1x8x32xbf16> to vector<8x32xbf16>
    %37 = vector.shape_cast %34 : vector<8x32xbf16> to vector<1x8x32xbf16>
    tpu.vector_store %arg6[%c0_15, %c0_16, %c0_17], %37 {strides = array<i32>} : memref<1x8x32xbf16, #tpu.memory_space<vmem>>, vector<1x8x32xbf16>,
    return
  }
  func.func @transform_0(%arg0: i32) -> (i32, i32, i32) {
    %c0_i32 = arith.constant 0 : i32
    %c0_i32_0 = arith.constant 0 : i32
    %c0_i32_1 = arith.constant 0 : i32
    return %arg0, %c0_i32, %c0_i32_0 : i32, i32, i32
  }
  func.func @transform_1(%arg0: i32) -> (i32, i32, i32) {
    %c0_i32 = arith.constant 0 : i32
    %c0_i32_0 = arith.constant 0 : i32
    %c0_i32_1 = arith.constant 0 : i32
    return %arg0, %c0_i32, %c0_i32_0 : i32, i32, i32
  }
  func.func @transform_2(%arg0: i32) -> (i32, i32) {
    %c0_i32 = arith.constant 0 : i32
    %c0_i32_0 = arith.constant 0 : i32
    %c0_i32_1 = arith.constant 0 : i32
    return %c0_i32, %c0_i32_0 : i32, i32
  }
  func.func @transform_3(%arg0: i32) -> (i32, i32) {
    %c0_i32 = arith.constant 0 : i32
    %c0_i32_0 = arith.constant 0 : i32
    %c0_i32_1 = arith.constant 0 : i32
    return %c0_i32, %c0_i32_0 : i32, i32
  }
  func.func @transform_4(%arg0: i32) -> (i32, i32) {
    %c0_i32 = arith.constant 0 : i32
    %c0_i32_0 = arith.constant 0 : i32
    %c0_i32_1 = arith.constant 0 : i32
    return %c0_i32, %c0_i32_0 : i32, i32
  }
  func.func @transform_5(%arg0: i32) -> (i32, i32, i32) {
    %c0_i32 = arith.constant 0 : i32
    %c0_i32_0 = arith.constant 0 : i32
    %c0_i32_1 = arith.constant 0 : i32
    return %arg0, %c0_i32, %c0_i32_0 : i32, i32, i32
  }
}

module attributes {stable_mosaic.version = 11 : i64} {
  func.func @_linear_kernel(%arg0: i32, %arg1: i32, %arg2: i32, %arg3: memref<16x32xbf16, #tpu.memory_space<vmem>>, %arg4: memref<32x64xbf16, #tpu.memory_space<vmem>>, %arg5: memref<1x64xf32, #tpu.memory_space<vmem>>, %arg6: memref<16x64xbf16, #tpu.memory_space<vmem>>, %arg7: memref<16x64xf32, #tpu.memory_space<vmem>>) attributes {dimension_semantics = [#tpu.dimension_semantics<parallel>, #tpu.dimension_semantics<parallel>, #tpu.dimension_semantics<arbitrary>], iteration_bounds = array<i64: 1, 1, 1>, scalar_prefetch = 0 : i64, scratch_operands = 1 : i64, tpu.core_type = #tpu.core_type<tc>, window_params = [{transform_indices = @transform_0, window_bounds = array<i64: 16, 32>}, {transform_indices = @transform_1, window_bounds = array<i64: 32, 64>}, {transform_indices = @transform_2, window_bounds = array<i64: 1, 64>}, {transform_indices = @transform_3, window_bounds = array<i64: 16, 64>}]} {
    %c0_i32 = arith.constant 0 : i32
    %0 = arith.cmpi eq, %arg2, %c0_i32 : i32
    %1 = arith.extui %0 : i1 to i32
    %c0_i32_0 = arith.constant 0 : i32
    %2 = arith.cmpi ne, %1, %c0_i32_0 : i32
    scf.if %2 {
      %cst_10 = arith.constant 0.000000e+00 : f32
      %12 = vector.broadcast %cst_10 : f32 to vector<16x64xf32>
      %c0_11 = arith.constant 0 : index
      %c0_12 = arith.constant 0 : index
      %13 = vector.load %arg7[%c0_11, %c0_12] : memref<16x64xf32, #tpu.memory_space<vmem>>, vector<16x64xf32>
      tpu.vector_store %arg7[%c0_11, %c0_12], %12 {strides = array<i32>} : memref<16x64xf32, #tpu.memory_space<vmem>>, vector<16x64xf32>,
    } else {
    }
    %c0 = arith.constant 0 : index
    %c0_1 = arith.constant 0 : index
    %3 = vector.load %arg7[%c0, %c0_1] : memref<16x64xf32, #tpu.memory_space<vmem>>, vector<16x64xf32>
    %c0_2 = arith.constant 0 : index
    %c0_3 = arith.constant 0 : index
    %4 = vector.load %arg3[%c0_2, %c0_3] : memref<16x32xbf16, #tpu.memory_space<vmem>>, vector<16x32xbf16>
    %c0_4 = arith.constant 0 : index
    %c0_5 = arith.constant 0 : index
    %5 = vector.load %arg4[%c0_4, %c0_5] : memref<32x64xbf16, #tpu.memory_space<vmem>>, vector<32x64xbf16>
    %cst = arith.constant dense<0.000000e+00> : vector<16x64xf32>
    %6 = tpu.matmul %4, %5, %cst {dimension_numbers = #tpu.dot_dimension_numbers<[1], [0], [0], [1], [0, 0, 1, 1], [], []>} : vector<16x32xbf16>, vector<32x64xbf16>, vector<16x64xf32> -> vector<16x64xf32>
    %7 = arith.addf %3, %6 : vector<16x64xf32>
    %c0_6 = arith.constant 0 : index
    %c0_7 = arith.constant 0 : index
    %8 = vector.load %arg7[%c0_6, %c0_7] : memref<16x64xf32, #tpu.memory_space<vmem>>, vector<16x64xf32>
    tpu.vector_store %arg7[%c0_6, %c0_7], %7 {strides = array<i32>} : memref<16x64xf32, #tpu.memory_space<vmem>>, vector<16x64xf32>,
    %c0_i32_8 = arith.constant 0 : i32
    %9 = arith.cmpi eq, %arg2, %c0_i32_8 : i32
    %10 = arith.extui %9 : i1 to i32
    %c0_i32_9 = arith.constant 0 : i32
    %11 = arith.cmpi ne, %10, %c0_i32_9 : i32
    scf.if %11 {
      %c0_10 = arith.constant 0 : index
      %c0_11 = arith.constant 0 : index
      %12 = vector.load %arg7[%c0_10, %c0_11] : memref<16x64xf32, #tpu.memory_space<vmem>>, vector<16x64xf32>
      %c0_12 = arith.constant 0 : index
      %c0_13 = arith.constant 0 : index
      %13 = vector.load %arg5[%c0_12, %c0_13] : memref<1x64xf32, #tpu.memory_space<vmem>>, vector<1x64xf32>
      %14 = vector.broadcast %13 : vector<1x64xf32> to vector<16x64xf32>
      %15 = arith.addf %12, %14 : vector<16x64xf32>
      %cst_14 = arith.constant 5.000000e-01 : f32
      %16 = vector.broadcast %cst_14 : f32 to vector<16x64xf32>
      %17 = arith.mulf %16, %15 : vector<16x64xf32>
      %cst_15 = arith.constant 4.471500e-02 : f32
      %18 = vector.broadcast %cst_15 : f32 to vector<16x64xf32>
      %19 = arith.mulf %18, %15 : vector<16x64xf32>
      %20 = arith.mulf %19, %15 : vector<16x64xf32>
      %21 = arith.mulf %20, %15 : vector<16x64xf32>
      %22 = arith.addf %15, %21 : vector<16x64xf32>
      %cst_16 = arith.constant 0.797884583 : f32
      %23 = vector.broadcast %cst_16 : f32 to vector<16x64xf32>
      %24 = arith.mulf %23, %22 : vector<16x64xf32>
      %25 = math.tanh %24 : vector<16x64xf32>
      %cst_17 = arith.constant 1.000000e+00 : f32
      %26 = vector.broadcast %cst_17 : f32 to vector<16x64xf32>
      %27 = arith.addf %26, %25 : vector<16x64xf32>
      %28 = arith.mulf %17, %27 : vector<16x64xf32>
      %29 = arith.truncf %28 : vector<16x64xf32> to vector<16x64xbf16>
      %c0_18 = arith.constant 0 : index
      %c0_19 = arith.constant 0 : index
      %30 = vector.load %arg6[%c0_18, %c0_19] : memref<16x64xbf16, #tpu.memory_space<vmem>>, vector<16x64xbf16>
      tpu.vector_store %arg6[%c0_18, %c0_19], %29 {strides = array<i32>} : memref<16x64xbf16, #tpu.memory_space<vmem>>, vector<16x64xbf16>,
    } else {
    }
    return
  }
  func.func @transform_0(%arg0: i32, %arg1: i32, %arg2: i32) -> (i32, i32) {
    %c0_i32 = arith.constant 0 : i32
    return %arg0, %arg2 : i32, i32
  }
  func.func @transform_1(%arg0: i32, %arg1: i32, %arg2: i32) -> (i32, i32) {
    %c0_i32 = arith.constant 0 : i32
    return %arg2, %arg1 : i32, i32
  }
  func.func @transform_2(%arg0: i32, %arg1: i32, %arg2: i32) -> (i32, i32) {
    %c0_i32 = arith.constant 0 : i32
    %c0_i32_0 = arith.constant 0 : i32
    return %c0_i32, %arg1 : i32, i32
  }
  func.func @transform_3(%arg0: i32, %arg1: i32, %arg2: i32) -> (i32, i32) {
    %c0_i32 = arith.constant 0 : i32
    return %arg0, %arg1 : i32, i32
  }
}

module attributes {stable_mosaic.version = 11 : i64} {
  func.func @_attn_block_kernel(%arg0: i32, %arg1: memref<1x8x96xbf16, #tpu.memory_space<vmem>>, %arg2: memref<1x1x8xi32, #tpu.memory_space<vmem>>, %arg3: memref<32x32xbf16, #tpu.memory_space<vmem>>, %arg4: memref<1x32xf32, #tpu.memory_space<vmem>>, %arg5: memref<1x8x32xbf16, #tpu.memory_space<vmem>>, %arg6: memref<1x32xf32, #tpu.memory_space<vmem>>, %arg7: memref<1x32xf32, #tpu.memory_space<vmem>>, %arg8: memref<1x8x32xbf16, #tpu.memory_space<vmem>>, %arg9: memref<8x32xf32, #tpu.memory_space<vmem>>) attributes {dimension_semantics = [#tpu.dimension_semantics<parallel>], iteration_bounds = array<i64: 2>, scalar_prefetch = 0 : i64, scratch_operands = 1 : i64, tpu.core_type = #tpu.core_type<tc>, window_params = [{transform_indices = @transform_0, window_bounds = array<i64: 1, 8, 96>}, {transform_indices = @transform_1, window_bounds = array<i64: 1, 1, 8>}, {pipeline_mode = #tpu.pipeline_mode<synchronous>, transform_indices = @transform_2, window_bounds = array<i64: 32, 32>}, {pipeline_mode = #tpu.pipeline_mode<synchronous>, transform_indices = @transform_3, window_bounds = array<i64: 1, 32>}, {transform_indices = @transform_4, window_bounds = array<i64: 1, 8, 32>}, {pipeline_mode = #tpu.pipeline_mode<synchronous>, transform_indices = @transform_5, window_bounds = array<i64: 1, 32>}, {pipeline_mode = #tpu.pipeline_mode<synchronous>, transform_indices = @transform_6, window_bounds = array<i64: 1, 32>}, {transform_indices = @transform_7, window_bounds = array<i64: 1, 8, 32>}]} {
    %c0 = arith.constant 0 : index
    %c0_0 = arith.constant 0 : index
    %c0_1 = arith.constant 0 : index
    %0 = vector.load %arg1[%c0, %c0_0, %c0_1] : memref<1x8x96xbf16, #tpu.memory_space<vmem>>, vector<1x8x96xbf16>
    %1 = vector.shape_cast %0 : vector<1x8x96xbf16> to vector<8x96xbf16>
    %c0_2 = arith.constant 0 : index
    %c0_3 = arith.constant 0 : index
    %c0_4 = arith.constant 0 : index
    %2 = vector.load %arg2[%c0_2, %c0_3, %c0_4] : memref<1x1x8xi32, #tpu.memory_space<vmem>>, vector<1x1x8xi32>
    %3 = vector.shape_cast %2 : vector<1x1x8xi32> to vector<1x8xi32>
    %4 = arith.sitofp %3 : vector<1x8xi32> to vector<1x8xf32>
    %cst = arith.constant 1.000000e+00 : f32
    %5 = vector.broadcast %cst : f32 to vector<1x8xf32>
    %6 = arith.subf %5, %4 : vector<1x8xf32>
    %cst_5 = arith.constant -1.000000e+04 : f32
    %7 = vector.broadcast %cst_5 : f32 to vector<1x8xf32>
    %8 = arith.mulf %6, %7 : vector<1x8xf32>
    %9 = vector.extract_strided_slice %1 {offsets = [0, 0], sizes = [8, 8], strides = [1, 1]} : vector<8x96xbf16> to vector<8x8xbf16>
    %10 = vector.extract_strided_slice %1 {offsets = [0, 32], sizes = [8, 8], strides = [1, 1]} : vector<8x96xbf16> to vector<8x8xbf16>
    %11 = vector.extract_strided_slice %1 {offsets = [0, 64], sizes = [8, 8], strides = [1, 1]} : vector<8x96xbf16> to vector<8x8xbf16>
    %cst_6 = arith.constant dense<0.000000e+00> : vector<8x8xf32>
    %12 = tpu.matmul %9, %10, %cst_6 {dimension_numbers = #tpu.dot_dimension_numbers<[1], [1], [0], [0], [0, 0, 1, 0], [], []>} : vector<8x8xbf16>, vector<8x8xbf16>, vector<8x8xf32> -> vector<8x8xf32>
    %13 = vector.broadcast %8 : vector<1x8xf32> to vector<8x8xf32>
    %14 = arith.addf %12, %13 : vector<8x8xf32>
    %cst_7 = arith.constant dense<0xFF800000> : vector<8xf32>
    %15 = vector.multi_reduction <maximumf>, %14, %cst_7 [1] : vector<8x8xf32> to vector<8xf32>
    %16 = vector.shape_cast %15 : vector<8xf32> to vector<8x1xf32>
    %17 = vector.broadcast %16 : vector<8x1xf32> to vector<8x8xf32>
    %18 = arith.subf %14, %17 : vector<8x8xf32>
    %19 = math.exp %18 : vector<8x8xf32>
    %cst_8 = arith.constant dense<0.000000e+00> : vector<8xf32>
    %20 = vector.multi_reduction <add>, %19, %cst_8 [1] : vector<8x8xf32> to vector<8xf32>
    %21 = vector.shape_cast %20 : vector<8xf32> to vector<8x1xf32>
    %22 = tpu.reciprocal %21 {approx = true} : vector<8x1xf32> -> vector<8x1xf32>
    %23 = vector.broadcast %22 : vector<8x1xf32> to vector<8x8xf32>
    %24 = arith.mulf %19, %23 : vector<8x8xf32>
    %25 = arith.truncf %24 : vector<8x8xf32> to vector<8x8xbf16>
    %cst_9 = arith.constant dense<0.000000e+00> : vector<8x8xf32>
    %26 = tpu.matmul %25, %11, %cst_9 {dimension_numbers = #tpu.dot_dimension_numbers<[1], [0], [0], [1], [0, 0, 1, 1], [], []>} : vector<8x8xbf16>, vector<8x8xbf16>, vector<8x8xf32> -> vector<8x8xf32>
    %c0_10 = arith.constant 0 : index
    %c0_11 = arith.constant 0 : index
    %27 = vector.load %arg9[%c0_10, %c0_11] : memref<8x32xf32, #tpu.memory_space<vmem>>, vector<8x8xf32>
    tpu.vector_store %arg9[%c0_10, %c0_11], %26 {strides = array<i32>} : memref<8x32xf32, #tpu.memory_space<vmem>>, vector<8x8xf32>,
    %28 = vector.extract_strided_slice %1 {offsets = [0, 8], sizes = [8, 8], strides = [1, 1]} : vector<8x96xbf16> to vector<8x8xbf16>
    %29 = vector.extract_strided_slice %1 {offsets = [0, 40], sizes = [8, 8], strides = [1, 1]} : vector<8x96xbf16> to vector<8x8xbf16>
    %30 = vector.extract_strided_slice %1 {offsets = [0, 72], sizes = [8, 8], strides = [1, 1]} : vector<8x96xbf16> to vector<8x8xbf16>
    %cst_12 = arith.constant dense<0.000000e+00> : vector<8x8xf32>
    %31 = tpu.matmul %28, %29, %cst_12 {dimension_numbers = #tpu.dot_dimension_numbers<[1], [1], [0], [0], [0, 0, 1, 0], [], []>} : vector<8x8xbf16>, vector<8x8xbf16>, vector<8x8xf32> -> vector<8x8xf32>
    %32 = vector.broadcast %8 : vector<1x8xf32> to vector<8x8xf32>
    %33 = arith.addf %31, %32 : vector<8x8xf32>
    %cst_13 = arith.constant dense<0xFF800000> : vector<8xf32>
    %34 = vector.multi_reduction <maximumf>, %33, %cst_13 [1] : vector<8x8xf32> to vector<8xf32>
    %35 = vector.shape_cast %34 : vector<8xf32> to vector<8x1xf32>
    %36 = vector.broadcast %35 : vector<8x1xf32> to vector<8x8xf32>
    %37 = arith.subf %33, %36 : vector<8x8xf32>
    %38 = math.exp %37 : vector<8x8xf32>
    %cst_14 = arith.constant dense<0.000000e+00> : vector<8xf32>
    %39 = vector.multi_reduction <add>, %38, %cst_14 [1] : vector<8x8xf32> to vector<8xf32>
    %40 = vector.shape_cast %39 : vector<8xf32> to vector<8x1xf32>
    %41 = tpu.reciprocal %40 {approx = true} : vector<8x1xf32> -> vector<8x1xf32>
    %42 = vector.broadcast %41 : vector<8x1xf32> to vector<8x8xf32>
    %43 = arith.mulf %38, %42 : vector<8x8xf32>
    %44 = arith.truncf %43 : vector<8x8xf32> to vector<8x8xbf16>
    %cst_15 = arith.constant dense<0.000000e+00> : vector<8x8xf32>
    %45 = tpu.matmul %44, %30, %cst_15 {dimension_numbers = #tpu.dot_dimension_numbers<[1], [0], [0], [1], [0, 0, 1, 1], [], []>} : vector<8x8xbf16>, vector<8x8xbf16>, vector<8x8xf32> -> vector<8x8xf32>
    %c0_16 = arith.constant 0 : index
    %c8 = arith.constant 8 : index
    %46 = vector.load %arg9[%c0_16, %c8] : memref<8x32xf32, #tpu.memory_space<vmem>>, vector<8x8xf32>
    tpu.vector_store %arg9[%c0_16, %c8], %45 {strides = array<i32>} : memref<8x32xf32, #tpu.memory_space<vmem>>, vector<8x8xf32>,
    %47 = vector.extract_strided_slice %1 {offsets = [0, 16], sizes = [8, 8], strides = [1, 1]} : vector<8x96xbf16> to vector<8x8xbf16>
    %48 = vector.extract_strided_slice %1 {offsets = [0, 48], sizes = [8, 8], strides = [1, 1]} : vector<8x96xbf16> to vector<8x8xbf16>
    %49 = vector.extract_strided_slice %1 {offsets = [0, 80], sizes = [8, 8], strides = [1, 1]} : vector<8x96xbf16> to vector<8x8xbf16>
    %cst_17 = arith.constant dense<0.000000e+00> : vector<8x8xf32>
    %50 = tpu.matmul %47, %48, %cst_17 {dimension_numbers = #tpu.dot_dimension_numbers<[1], [1], [0], [0], [0, 0, 1, 0], [], []>} : vector<8x8xbf16>, vector<8x8xbf16>, vector<8x8xf32> -> vector<8x8xf32>
    %51 = vector.broadcast %8 : vector<1x8xf32> to vector<8x8xf32>
    %52 = arith.addf %50, %51 : vector<8x8xf32>
    %cst_18 = arith.constant dense<0xFF800000> : vector<8xf32>
    %53 = vector.multi_reduction <maximumf>, %52, %cst_18 [1] : vector<8x8xf32> to vector<8xf32>
    %54 = vector.shape_cast %53 : vector<8xf32> to vector<8x1xf32>
    %55 = vector.broadcast %54 : vector<8x1xf32> to vector<8x8xf32>
    %56 = arith.subf %52, %55 : vector<8x8xf32>
    %57 = math.exp %56 : vector<8x8xf32>
    %cst_19 = arith.constant dense<0.000000e+00> : vector<8xf32>
    %58 = vector.multi_reduction <add>, %57, %cst_19 [1] : vector<8x8xf32> to vector<8xf32>
    %59 = vector.shape_cast %58 : vector<8xf32> to vector<8x1xf32>
    %60 = tpu.reciprocal %59 {approx = true} : vector<8x1xf32> -> vector<8x1xf32>
    %61 = vector.broadcast %60 : vector<8x1xf32> to vector<8x8xf32>
    %62 = arith.mulf %57, %61 : vector<8x8xf32>
    %63 = arith.truncf %62 : vector<8x8xf32> to vector<8x8xbf16>
    %cst_20 = arith.constant dense<0.000000e+00> : vector<8x8xf32>
    %64 = tpu.matmul %63, %49, %cst_20 {dimension_numbers = #tpu.dot_dimension_numbers<[1], [0], [0], [1], [0, 0, 1, 1], [], []>} : vector<8x8xbf16>, vector<8x8xbf16>, vector<8x8xf32> -> vector<8x8xf32>
    %c0_21 = arith.constant 0 : index
    %c16 = arith.constant 16 : index
    %65 = vector.load %arg9[%c0_21, %c16] : memref<8x32xf32, #tpu.memory_space<vmem>>, vector<8x8xf32>
    tpu.vector_store %arg9[%c0_21, %c16], %64 {strides = array<i32>} : memref<8x32xf32, #tpu.memory_space<vmem>>, vector<8x8xf32>,
    %66 = vector.extract_strided_slice %1 {offsets = [0, 24], sizes = [8, 8], strides = [1, 1]} : vector<8x96xbf16> to vector<8x8xbf16>
    %67 = vector.extract_strided_slice %1 {offsets = [0, 56], sizes = [8, 8], strides = [1, 1]} : vector<8x96xbf16> to vector<8x8xbf16>
    %68 = vector.extract_strided_slice %1 {offsets = [0, 88], sizes = [8, 8], strides = [1, 1]} : vector<8x96xbf16> to vector<8x8xbf16>
    %cst_22 = arith.constant dense<0.000000e+00> : vector<8x8xf32>
    %69 = tpu.matmul %66, %67, %cst_22 {dimension_numbers = #tpu.dot_dimension_numbers<[1], [1], [0], [0], [0, 0, 1, 0], [], []>} : vector<8x8xbf16>, vector<8x8xbf16>, vector<8x8xf32> -> vector<8x8xf32>
    %70 = vector.broadcast %8 : vector<1x8xf32> to vector<8x8xf32>
    %71 = arith.addf %69, %70 : vector<8x8xf32>
    %cst_23 = arith.constant dense<0xFF800000> : vector<8xf32>
    %72 = vector.multi_reduction <maximumf>, %71, %cst_23 [1] : vector<8x8xf32> to vector<8xf32>
    %73 = vector.shape_cast %72 : vector<8xf32> to vector<8x1xf32>
    %74 = vector.broadcast %73 : vector<8x1xf32> to vector<8x8xf32>
    %75 = arith.subf %71, %74 : vector<8x8xf32>
    %76 = math.exp %75 : vector<8x8xf32>
    %cst_24 = arith.constant dense<0.000000e+00> : vector<8xf32>
    %77 = vector.multi_reduction <add>, %76, %cst_24 [1] : vector<8x8xf32> to vector<8xf32>
    %78 = vector.shape_cast %77 : vector<8xf32> to vector<8x1xf32>
    %79 = tpu.reciprocal %78 {approx = true} : vector<8x1xf32> -> vector<8x1xf32>
    %80 = vector.broadcast %79 : vector<8x1xf32> to vector<8x8xf32>
    %81 = arith.mulf %76, %80 : vector<8x8xf32>
    %82 = arith.truncf %81 : vector<8x8xf32> to vector<8x8xbf16>
    %cst_25 = arith.constant dense<0.000000e+00> : vector<8x8xf32>
    %83 = tpu.matmul %82, %68, %cst_25 {dimension_numbers = #tpu.dot_dimension_numbers<[1], [0], [0], [1], [0, 0, 1, 1], [], []>} : vector<8x8xbf16>, vector<8x8xbf16>, vector<8x8xf32> -> vector<8x8xf32>
    %c0_26 = arith.constant 0 : index
    %c24 = arith.constant 24 : index
    %84 = vector.load %arg9[%c0_26, %c24] : memref<8x32xf32, #tpu.memory_space<vmem>>, vector<8x8xf32>
    tpu.vector_store %arg9[%c0_26, %c24], %83 {strides = array<i32>} : memref<8x32xf32, #tpu.memory_space<vmem>>, vector<8x8xf32>,
    %c0_27 = arith.constant 0 : index
    %c0_28 = arith.constant 0 : index
    %85 = vector.load %arg9[%c0_27, %c0_28] : memref<8x32xf32, #tpu.memory_space<vmem>>, vector<8x32xf32>
    %86 = arith.truncf %85 : vector<8x32xf32> to vector<8x32xbf16>
    %c0_29 = arith.constant 0 : index
    %c0_30 = arith.constant 0 : index
    %87 = vector.load %arg3[%c0_29, %c0_30] : memref<32x32xbf16, #tpu.memory_space<vmem>>, vector<32x32xbf16>
    %cst_31 = arith.constant dense<0.000000e+00> : vector<8x32xf32>
    %88 = tpu.matmul %86, %87, %cst_31 {dimension_numbers = #tpu.dot_dimension_numbers<[1], [0], [0], [1], [0, 0, 1, 1], [], []>} : vector<8x32xbf16>, vector<32x32xbf16>, vector<8x32xf32> -> vector<8x32xf32>
    %c0_32 = arith.constant 0 : index
    %c0_33 = arith.constant 0 : index
    %89 = vector.load %arg4[%c0_32, %c0_33] : memref<1x32xf32, #tpu.memory_space<vmem>>, vector<1x32xf32>
    %90 = vector.broadcast %89 : vector<1x32xf32> to vector<8x32xf32>
    %91 = arith.addf %88, %90 : vector<8x32xf32>
    %c0_34 = arith.constant 0 : index
    %c0_35 = arith.constant 0 : index
    %c0_36 = arith.constant 0 : index
    %92 = vector.load %arg5[%c0_34, %c0_35, %c0_36] : memref<1x8x32xbf16, #tpu.memory_space<vmem>>, vector<1x8x32xbf16>
    %93 = vector.shape_cast %92 : vector<1x8x32xbf16> to vector<8x32xbf16>
    %94 = arith.extf %93 : vector<8x32xbf16> to vector<8x32xf32>
    %95 = arith.addf %91, %94 : vector<8x32xf32>
    %cst_37 = arith.constant dense<0.000000e+00> : vector<8xf32>
    %96 = vector.multi_reduction <add>, %95, %cst_37 [1] : vector<8x32xf32> to vector<8xf32>
    %97 = vector.shape_cast %96 : vector<8xf32> to vector<8x1xf32>
    %cst_38 = arith.constant 3.200000e+01 : f32
    %98 = vector.broadcast %cst_38 : f32 to vector<8x1xf32>
    %99 = arith.divf %97, %98 : vector<8x1xf32>
    %100 = vector.broadcast %99 : vector<8x1xf32> to vector<8x32xf32>
    %101 = arith.subf %95, %100 : vector<8x32xf32>
    %102 = arith.mulf %101, %101 : vector<8x32xf32>
    %cst_39 = arith.constant dense<0.000000e+00> : vector<8xf32>
    %103 = vector.multi_reduction <add>, %102, %cst_39 [1] : vector<8x32xf32> to vector<8xf32>
    %104 = vector.shape_cast %103 : vector<8xf32> to vector<8x1xf32>
    %cst_40 = arith.constant 3.200000e+01 : f32
    %105 = vector.broadcast %cst_40 : f32 to vector<8x1xf32>
    %106 = arith.divf %104, %105 : vector<8x1xf32>
    %107 = vector.broadcast %99 : vector<8x1xf32> to vector<8x32xf32>
    %108 = arith.subf %95, %107 : vector<8x32xf32>
    %cst_41 = arith.constant 9.99999996E-13 : f32
    %109 = vector.broadcast %cst_41 : f32 to vector<8x1xf32>
    %110 = arith.addf %106, %109 : vector<8x1xf32>
    %111 = math.rsqrt %110 : vector<8x1xf32>
    %112 = vector.broadcast %111 : vector<8x1xf32> to vector<8x32xf32>
    %113 = arith.mulf %108, %112 : vector<8x32xf32>
    %c0_42 = arith.constant 0 : index
    %c0_43 = arith.constant 0 : index
    %114 = vector.load %arg6[%c0_42, %c0_43] : memref<1x32xf32, #tpu.memory_space<vmem>>, vector<1x32xf32>
    %115 = vector.broadcast %114 : vector<1x32xf32> to vector<8x32xf32>
    %116 = arith.mulf %113, %115 : vector<8x32xf32>
    %c0_44 = arith.constant 0 : index
    %c0_45 = arith.constant 0 : index
    %117 = vector.load %arg7[%c0_44, %c0_45] : memref<1x32xf32, #tpu.memory_space<vmem>>, vector<1x32xf32>
    %118 = vector.broadcast %117 : vector<1x32xf32> to vector<8x32xf32>
    %119 = arith.addf %116, %118 : vector<8x32xf32>
    %120 = arith.truncf %119 : vector<8x32xf32> to vector<8x32xbf16>
    %c0_46 = arith.constant 0 : index
    %c0_47 = arith.constant 0 : index
    %c0_48 = arith.constant 0 : index
    %121 = vector.load %arg8[%c0_46, %c0_47, %c0_48] : memref<1x8x32xbf16, #tpu.memory_space<vmem>>, vector<1x8x32xbf16>
    %122 = vector.shape_cast %121 : vector<1x8x32xbf16> to vector<8x32xbf16>
    %123 = vector.shape_cast %120 : vector<8x32xbf16> to vector<1x8x32xbf16>
    tpu.vector_store %arg8[%c0_46, %c0_47, %c0_48], %123 {strides = array<i32>} : memref<1x8x32xbf16, #tpu.memory_space<vmem>>, vector<1x8x32xbf16>,
    return
  }
  func.func @transform_0(%arg0: i32) -> (i32, i32, i32) {
    %c0_i32 = arith.constant 0 : i32
    %c0_i32_0 = arith.constant 0 : i32
    %c0_i32_1 = arith.constant 0 : i32
    return %arg0, %c0_i32, %c0_i32_0 : i32, i32, i32
  }
  func.func @transform_1(%arg0: i32) -> (i32, i32, i32) {
    %c0_i32 = arith.constant 0 : i32
    %c0_i32_0 = arith.constant 0 : i32
    %c0_i32_1 = arith.constant 0 : i32
    return %arg0, %c0_i32, %c0_i32_0 : i32, i32, i32
  }
  func.func @transform_2(%arg0: i32) -> (i32, i32) {
    %c0_i32 = arith.constant 0 : i32
    %c0_i32_0 = arith.constant 0 : i32
    %c0_i32_1 = arith.constant 0 : i32
    return %c0_i32, %c0_i32_0 : i32, i32
  }
  func.func @transform_3(%arg0: i32) -> (i32, i32) {
    %c0_i32 = arith.constant 0 : i32
    %c0_i32_0 = arith.constant 0 : i32
    %c0_i32_1 = arith.constant 0 : i32
    return %c0_i32, %c0_i32_0 : i32, i32
  }
  func.func @transform_4(%arg0: i32) -> (i32, i32, i32) {
    %c0_i32 = arith.constant 0 : i32
    %c0_i32_0 = arith.constant 0 : i32
    %c0_i32_1 = arith.constant 0 : i32
    return %arg0, %c0_i32, %c0_i32_0 : i32, i32, i32
  }
  func.func @transform_5(%arg0: i32) -> (i32, i32) {
    %c0_i32 = arith.constant 0 : i32
    %c0_i32_0 = arith.constant 0 : i32
    %c0_i32_1 = arith.constant 0 : i32
    return %c0_i32, %c0_i32_0 : i32, i32
  }
  func.func @transform_6(%arg0: i32) -> (i32, i32) {
    %c0_i32 = arith.constant 0 : i32
    %c0_i32_0 = arith.constant 0 : i32
    %c0_i32_1 = arith.constant 0 : i32
    return %c0_i32, %c0_i32_0 : i32, i32
  }
  func.func @transform_7(%arg0: i32) -> (i32, i32, i32) {
    %c0_i32 = arith.constant 0 : i32
    %c0_i32_0 = arith.constant 0 : i32
    %c0_i32_1 = arith.constant 0 : i32
    return %arg0, %c0_i32, %c0_i32_0 : i32, i32, i32
  }
}

module attributes {stable_mosaic.version = 11 : i64} {
  func.func @_linear_res_ln_kernel(%arg0: i32, %arg1: i32, %arg2: memref<16x64xbf16, #tpu.memory_space<vmem>>, %arg3: memref<64x32xbf16, #tpu.memory_space<vmem>>, %arg4: memref<1x32xf32, #tpu.memory_space<vmem>>, %arg5: memref<16x32xbf16, #tpu.memory_space<vmem>>, %arg6: memref<1x32xf32, #tpu.memory_space<vmem>>, %arg7: memref<1x32xf32, #tpu.memory_space<vmem>>, %arg8: memref<16x32xbf16, #tpu.memory_space<vmem>>, %arg9: memref<16x32xf32, #tpu.memory_space<vmem>>) attributes {dimension_semantics = [#tpu.dimension_semantics<parallel>, #tpu.dimension_semantics<arbitrary>], iteration_bounds = array<i64: 1, 1>, scalar_prefetch = 0 : i64, scratch_operands = 1 : i64, tpu.core_type = #tpu.core_type<tc>, window_params = [{transform_indices = @transform_0, window_bounds = array<i64: 16, 64>}, {transform_indices = @transform_1, window_bounds = array<i64: 64, 32>}, {pipeline_mode = #tpu.pipeline_mode<synchronous>, transform_indices = @transform_2, window_bounds = array<i64: 1, 32>}, {transform_indices = @transform_3, window_bounds = array<i64: 16, 32>}, {pipeline_mode = #tpu.pipeline_mode<synchronous>, transform_indices = @transform_4, window_bounds = array<i64: 1, 32>}, {pipeline_mode = #tpu.pipeline_mode<synchronous>, transform_indices = @transform_5, window_bounds = array<i64: 1, 32>}, {transform_indices = @transform_6, window_bounds = array<i64: 16, 32>}]} {
    %c0_i32 = arith.constant 0 : i32
    %0 = arith.cmpi eq, %arg1, %c0_i32 : i32
    %1 = arith.extui %0 : i1 to i32
    %c0_i32_0 = arith.constant 0 : i32
    %2 = arith.cmpi ne, %1, %c0_i32_0 : i32
    scf.if %2 {
      %cst_10 = arith.constant 0.000000e+00 : f32
      %12 = vector.broadcast %cst_10 : f32 to vector<16x32xf32>
      %c0_11 = arith.constant 0 : index
      %c0_12 = arith.constant 0 : index
      %13 = vector.load %arg9[%c0_11, %c0_12] : memref<16x32xf32, #tpu.memory_space<vmem>>, vector<16x32xf32>
      tpu.vector_store %arg9[%c0_11, %c0_12], %12 {strides = array<i32>} : memref<16x32xf32, #tpu.memory_space<vmem>>, vector<16x32xf32>,
    } else {
    }
    %c0 = arith.constant 0 : index
    %c0_1 = arith.constant 0 : index
    %3 = vector.load %arg9[%c0, %c0_1] : memref<16x32xf32, #tpu.memory_space<vmem>>, vector<16x32xf32>
    %c0_2 = arith.constant 0 : index
    %c0_3 = arith.constant 0 : index
    %4 = vector.load %arg2[%c0_2, %c0_3] : memref<16x64xbf16, #tpu.memory_space<vmem>>, vector<16x64xbf16>
    %c0_4 = arith.constant 0 : index
    %c0_5 = arith.constant 0 : index
    %5 = vector.load %arg3[%c0_4, %c0_5] : memref<64x32xbf16, #tpu.memory_space<vmem>>, vector<64x32xbf16>
    %cst = arith.constant dense<0.000000e+00> : vector<16x32xf32>
    %6 = tpu.matmul %4, %5, %cst {dimension_numbers = #tpu.dot_dimension_numbers<[1], [0], [0], [1], [0, 0, 1, 1], [], []>} : vector<16x64xbf16>, vector<64x32xbf16>, vector<16x32xf32> -> vector<16x32xf32>
    %7 = arith.addf %3, %6 : vector<16x32xf32>
    %c0_6 = arith.constant 0 : index
    %c0_7 = arith.constant 0 : index
    %8 = vector.load %arg9[%c0_6, %c0_7] : memref<16x32xf32, #tpu.memory_space<vmem>>, vector<16x32xf32>
    tpu.vector_store %arg9[%c0_6, %c0_7], %7 {strides = array<i32>} : memref<16x32xf32, #tpu.memory_space<vmem>>, vector<16x32xf32>,
    %c0_i32_8 = arith.constant 0 : i32
    %9 = arith.cmpi eq, %arg1, %c0_i32_8 : i32
    %10 = arith.extui %9 : i1 to i32
    %c0_i32_9 = arith.constant 0 : i32
    %11 = arith.cmpi ne, %10, %c0_i32_9 : i32
    scf.if %11 {
      %c0_10 = arith.constant 0 : index
      %c0_11 = arith.constant 0 : index
      %12 = vector.load %arg9[%c0_10, %c0_11] : memref<16x32xf32, #tpu.memory_space<vmem>>, vector<16x32xf32>
      %c0_12 = arith.constant 0 : index
      %c0_13 = arith.constant 0 : index
      %13 = vector.load %arg4[%c0_12, %c0_13] : memref<1x32xf32, #tpu.memory_space<vmem>>, vector<1x32xf32>
      %14 = vector.broadcast %13 : vector<1x32xf32> to vector<16x32xf32>
      %15 = arith.addf %12, %14 : vector<16x32xf32>
      %c0_14 = arith.constant 0 : index
      %c0_15 = arith.constant 0 : index
      %16 = vector.load %arg5[%c0_14, %c0_15] : memref<16x32xbf16, #tpu.memory_space<vmem>>, vector<16x32xbf16>
      %17 = arith.extf %16 : vector<16x32xbf16> to vector<16x32xf32>
      %18 = arith.addf %15, %17 : vector<16x32xf32>
      %cst_16 = arith.constant dense<0.000000e+00> : vector<16xf32>
      %19 = vector.multi_reduction <add>, %18, %cst_16 [1] : vector<16x32xf32> to vector<16xf32>
      %20 = vector.shape_cast %19 : vector<16xf32> to vector<16x1xf32>
      %cst_17 = arith.constant 3.200000e+01 : f32
      %21 = vector.broadcast %cst_17 : f32 to vector<16x1xf32>
      %22 = arith.divf %20, %21 : vector<16x1xf32>
      %23 = vector.broadcast %22 : vector<16x1xf32> to vector<16x32xf32>
      %24 = arith.subf %18, %23 : vector<16x32xf32>
      %25 = arith.mulf %24, %24 : vector<16x32xf32>
      %cst_18 = arith.constant dense<0.000000e+00> : vector<16xf32>
      %26 = vector.multi_reduction <add>, %25, %cst_18 [1] : vector<16x32xf32> to vector<16xf32>
      %27 = vector.shape_cast %26 : vector<16xf32> to vector<16x1xf32>
      %cst_19 = arith.constant 3.200000e+01 : f32
      %28 = vector.broadcast %cst_19 : f32 to vector<16x1xf32>
      %29 = arith.divf %27, %28 : vector<16x1xf32>
      %30 = vector.broadcast %22 : vector<16x1xf32> to vector<16x32xf32>
      %31 = arith.subf %18, %30 : vector<16x32xf32>
      %cst_20 = arith.constant 9.99999996E-13 : f32
      %32 = vector.broadcast %cst_20 : f32 to vector<16x1xf32>
      %33 = arith.addf %29, %32 : vector<16x1xf32>
      %34 = math.rsqrt %33 : vector<16x1xf32>
      %35 = vector.broadcast %34 : vector<16x1xf32> to vector<16x32xf32>
      %36 = arith.mulf %31, %35 : vector<16x32xf32>
      %c0_21 = arith.constant 0 : index
      %c0_22 = arith.constant 0 : index
      %37 = vector.load %arg6[%c0_21, %c0_22] : memref<1x32xf32, #tpu.memory_space<vmem>>, vector<1x32xf32>
      %38 = vector.broadcast %37 : vector<1x32xf32> to vector<16x32xf32>
      %39 = arith.mulf %36, %38 : vector<16x32xf32>
      %c0_23 = arith.constant 0 : index
      %c0_24 = arith.constant 0 : index
      %40 = vector.load %arg7[%c0_23, %c0_24] : memref<1x32xf32, #tpu.memory_space<vmem>>, vector<1x32xf32>
      %41 = vector.broadcast %40 : vector<1x32xf32> to vector<16x32xf32>
      %42 = arith.addf %39, %41 : vector<16x32xf32>
      %43 = arith.truncf %42 : vector<16x32xf32> to vector<16x32xbf16>
      %c0_25 = arith.constant 0 : index
      %c0_26 = arith.constant 0 : index
      %44 = vector.load %arg8[%c0_25, %c0_26] : memref<16x32xbf16, #tpu.memory_space<vmem>>, vector<16x32xbf16>
      tpu.vector_store %arg8[%c0_25, %c0_26], %43 {strides = array<i32>} : memref<16x32xbf16, #tpu.memory_space<vmem>>, vector<16x32xbf16>,
    } else {
    }
    return
  }
  func.func @transform_0(%arg0: i32, %arg1: i32) -> (i32, i32) {
    %c0_i32 = arith.constant 0 : i32
    return %arg0, %arg1 : i32, i32
  }
  func.func @transform_1(%arg0: i32, %arg1: i32) -> (i32, i32) {
    %c0_i32 = arith.constant 0 : i32
    %c0_i32_0 = arith.constant 0 : i32
    return %arg1, %c0_i32 : i32, i32
  }
  func.func @transform_2(%arg0: i32, %arg1: i32) -> (i32, i32) {
    %c0_i32 = arith.constant 0 : i32
    %c0_i32_0 = arith.constant 0 : i32
    %c0_i32_1 = arith.constant 0 : i32
    return %c0_i32, %c0_i32_0 : i32, i32
  }
  func.func @transform_3(%arg0: i32, %arg1: i32) -> (i32, i32) {
    %c0_i32 = arith.constant 0 : i32
    %c0_i32_0 = arith.constant 0 : i32
    return %arg0, %c0_i32 : i32, i32
  }
  func.func @transform_4(%arg0: i32, %arg1: i32) -> (i32, i32) {
    %c0_i32 = arith.constant 0 : i32
    %c0_i32_0 = arith.constant 0 : i32
    %c0_i32_1 = arith.constant 0 : i32
    return %c0_i32, %c0_i32_0 : i32, i32
  }
  func.func @transform_5(%arg0: i32, %arg1: i32) -> (i32, i32) {
    %c0_i32 = arith.constant 0 : i32
    %c0_i32_0 = arith.constant 0 : i32
    %c0_i32_1 = arith.constant 0 : i32
    return %c0_i32, %c0_i32_0 : i32, i32
  }
  func.func @transform_6(%arg0: i32, %arg1: i32) -> (i32, i32) {
    %c0_i32 = arith.constant 0 : i32
    %c0_i32_0 = arith.constant 0 : i32
    return %arg0, %c0_i32 : i32, i32
  }
}

</mosaic_0001>

<bundles_post_ra>
// kernel: bert_forward.10
= control target key start
LH: loop header
LB: loop body
LE: loop exit
PB: predicated region body
PF: predicated region fallthrough
CT: control target
= control target key end

     0   :  { %vm19_vm0 = vcmask 785408   ;;  %v108_v1 = vmov 0.0   ;;  %vm47_vm1 = vcmask 261120   ;;  %vm83_vm2 = vcmask 781312   ;;  %s151_s1 = inlined_call_operand.vmem [shape: bf16[32,96], index: 1, kind: input, shape index: {}]   ;;  %s152_s2 = inlined_call_operand.vmem [shape: f32[1,96], index: 2, kind: input, shape index: {}]   ;;  %s153_s0 = inlined_call_operand.vmem [shape: bf16[16,32], index: 0, kind: input, shape index: {}]   ;;  %s154_s3 = inlined_call_operand.vmem [shape: bf16[16,96], index: 3, kind: output, shape index: {}]  }
   0x1   :  { %v105_v0 = vld [vmem:[%s151_s1 + $0x8] sm:$0xff]  ;;  %20 = vst.msk [vmem:[#allocation2] sm:$0xff] %vm19_vm0, %v108_v1  ;;  %v104_v2 = vld [vmem:[%s151_s1] sm:$0xff] }
   0x2   :  { %21 = vst.msk [vmem:[#allocation2 + $0x8] sm:$0xff] %vm19_vm0, %v108_v1  ;;  %57 = vmatpush.bf16.msra.mxu0 %v105_v0  ;;  %v103_v3 = vld [vmem:[%s153_s0] sm:$0xff] }
   0x3   :  { %v107_v8 = vld [vmem:[%s152_s2] ss:$0 sm:$0xff] }
   0x6   :  { %58 = vmatpush.bf16.msra.mxu0 %v104_v2 }
   0x8   :  { %v22_v4 = vld [vmem:[#allocation2] sm:$0xff] }
   0x9   :  { %102 = vmatmul.msk.bf16.vlgmr.msra.gmra.mxu0 %vm47_vm1, %v103_v3  ;;  %v23_v7 = vld [vmem:[#allocation2 + $0x8] sm:$0xff] }
  0x86   :  { %v60_v5 = vpop.f32.mrf.mxu0 }
  0x87   :  { %v65_v6 = vadd.f32 %v60_v5, %v22_v4 }
  0x89   :  { %68 = vst.msk [vmem:[#allocation2] sm:$0xff] %vm19_vm0, %v65_v6 }
  0x8e   :  { %v62_v9 = vpop.f32.mrf.mxu0 }
  0x8f   :  { %v66_v10 = vadd.f32 %v62_v9, %v23_v7 }
  0x90   :  { %v73_v11 = vld [vmem:[#allocation2] sm:$0xff] }
  0x91   :  { %v79_v12 = vadd.f32 %v107_v8, %v73_v11  ;;  %69 = vst.msk [vmem:[#allocation2 + $0x8] sm:$0xff] %vm19_vm0, %v66_v10 }
  0x93   :  { %v81_v13 = vpack.c.bf16 %v79_v12, %v79_v12 }
  0x95   :  { %84 = vst.msk [vmem:[%s154_s3] sm:$0xf] %vm83_vm2, %v81_v13 }
  0x98   :  { %v74_v14 = vld [vmem:[#allocation2 + $0x8] sm:$0xff] }
  0x99   :  { %v80_v15 = vadd.f32 %v107_v8, %v74_v14 }
  0x9b   :  { %v82_v16 = vpack.c.bf16 %v80_v15, %v80_v15 }
  0x9d   :  { %85 = vst.msk [vmem:[%s154_s3 + $0x4] sm:$0xf] %vm83_vm2, %v82_v16 }

// kernel: bert_forward.9
= control target key start
LH: loop header
LB: loop body
LE: loop exit
PB: predicated region body
PF: predicated region fallthrough
CT: control target
= control target key end

     0   :  { %s417_s18 = smov 0   ;;  %s453_s0 = inlined_call_operand.vmem [shape: bf16[2,8,32], index: 0, kind: input, shape index: {}]   ;;  %s454_s1 = inlined_call_operand.vmem [shape: bf16[2,8,32], index: 1, kind: input, shape index: {}]   ;;  %s455_s2 = inlined_call_operand.vmem [shape: bf16[8,32], index: 2, kind: input, shape index: {}]   ;;  %s456_s3 = inlined_call_operand.vmem [shape: f32[1,32], index: 3, kind: input, shape index: {}]   ;;  %s457_s4 = inlined_call_operand.vmem [shape: f32[1,32], index: 4, kind: input, shape index: {}]   ;;  %s458_s5 = inlined_call_operand.vmem [shape: bf16[2,8,32], index: 5, kind: output, shape index: {}]  }
   0x1 LB: > { %s353_s19 = sadd.s32 4294967295, %s384_s18   ;;  %p357_p0 = scmp.ge.s32.totalorder %s384_s18, 1  ;;  %s384_s18 = sphi %s417_s18, %s15_s18  }
   0x2   : > { %p195_p1 = scmp.lt.s32.totalorder %s384_s18, 3 }
   0x4   : > { %p196_p2 = pnand %p357_p0, %p195_p1 }
   0x5   : > { %p225_p3 = scmp.lt.s32.totalorder (!%p196_p2), %s353_s19, 1 }
   0x6   : > { %199 = sbr.rel (%p196_p2) target bundleno = 293 (0x125), region = 40 }
   0xb   : > { %s460_s19 = smov (!%p225_p3, %s353_s19), 1  ;;  %v242_v0 = vld [vmem:[%s455_s2] sm:$0xf]  ;;  %vm245_vm0 = vcmask 261120   ;;  %v386_v9 = vmov 32.0   ;;  %vm286_vm5 = vcmask 257024  }
   0xc   : > { %s425_s20 = sshll.u32 %s460_s19, 2  ;;  %v243_v5 = vunpack.c.l.bf16 %v242_v0  ;;  %374 = vrcp.f32 %v386_v9  ;;  %v372_v30 = vld [vmem:[%s456_s3] ss:$0 sm:$0xff] }
   0xd   : > { %s228_s25 = scalar_lea.vmem %s453_s0, %s425_s20  ;;  %s232_s28 = scalar_lea.vmem %s454_s1, %s425_s20  ;;  %v373_v32 = vld [vmem:[%s457_s4] ss:$0 sm:$0xff] }
   0xe   : > { %v237_v1 = vld [vmem:[%s228_s25] sm:$0xf]  ;;  %s236_s10 = scalar_lea.vmem %s458_s5, %s425_s20 }
   0xf   : > { %v239_v2 = vld [vmem:[%s232_s28] sm:$0xf]  ;;  %v238_v3 = vunpack.c.l.bf16 %v237_v1 }
  0x10   : > { %v240_v4 = vunpack.c.l.bf16 %v239_v2 }
  0x12   : > { %v241_v6 = vadd.f32 %v240_v4, %v238_v3  ;;  %v375_v10 = vpop.eup %374 }
  0x13   : > { %v250_v11 = vmul.f32 32.0, %v375_v10  ;;  %vm254_vm1 = vweird.f32 %v375_v10 }
  0x14   : > { %v244_v7 = vadd.f32 %v243_v5, %v241_v6 }
  0x15   : > { %v251_v12 = vsub.f32 1.0, %v250_v11 }
  0x16   : > { %v246_v8 = vsel %vm245_vm0, %v244_v7, 0.0 }
  0x17   : > { %247 = vadd.xlane.f32.xlu0 %v246_v8  ;;  %v252_v13 = vmul.f32 %v375_v10, %v251_v12 }
  0x19   : > { %v253_v14 = vadd.f32 %v375_v10, %v252_v13 }
  0x1b   : > { %v255_v15 = vsel %vm254_vm1, %v375_v10, %v253_v14 }
  0x8a   : > { %v248_v16 = vpop.xlane.xlu0 %247 }
  0x8b   : > { %v256_v17 = vmul.f32 %v255_v15, %v248_v16 }
  0x8d   : > { %v257_v18 = vsub.f32 %v244_v7, %v256_v17 }
  0x8f   : > { %v258_v19 = vmul.f32 %v257_v18, %v257_v18 }
  0x91   : > { %v259_v20 = vsel %vm245_vm0, %v258_v19, 0.0 }
  0x92   : > { %260 = vadd.xlane.f32.xlu0 %v259_v20 }
 0x105   : > { %v261_v21 = vpop.xlane.xlu0 %260 }
 0x106   : > { %v262_v22 = vmul.f32 %v261_v21, %v255_v15 }
 0x108   : > { %v263_v23 = vadd.f32 1e-12, %v262_v22 }
 0x10a   : > { %376 = vrsqrt.f32 %v263_v23  ;;  %vm270_vm3 = vweird.f32 %v263_v23 }
 0x110   : > { %v377_v24 = vpop.eup %376 }
 0x111   : > { %v265_v25 = vmul.f32 %v377_v24, %v263_v23  ;;  %vm271_vm2 = vweird.f32 %v377_v24 }
 0x112   : > { %vm272_vm4 = vmor %vm270_vm3, %vm271_vm2 }
 0x113   : > { %v266_v26 = vmul.f32 %v377_v24, %v265_v25 }
 0x115   : > { %v267_v27 = vmul.f32 0.5, %v266_v26 }
 0x117   : > { %v268_v28 = vsub.f32 1.5, %v267_v27 }
 0x119   : > { %v269_v29 = vmul.f32 %v377_v24, %v268_v28 }
 0x11b   : > { %v273_v31 = vsel %vm272_vm4, %v377_v24, %v269_v29 }
 0x11c   : > { %v274_v33 = vmul.f32 %v273_v31, %v257_v18 }
 0x11e   : > { %v279_v34 = vmul.f32 %v372_v30, %v274_v33 }
 0x120   : > { %v284_v35 = vadd.f32 %v373_v32, %v279_v34 }
 0x122   : > { %v285_v36 = vpack.c.bf16 %v284_v35, %v284_v35 }
 0x124   : > { %287 = vst.msk [vmem:[%s236_s10] sm:$0xf] %vm286_vm5, %v285_v36 }
 0x125 PF: > { %s15_s18 = sadd.s32 1, %s384_s18  }
 0x126   : > { %p12_p4 = scmp.ge.s32.totalorder %s15_s18, 4  }
 0x128   :  { %14 = sbr.rel (!%p12_p4) target bundleno = 1 (0x1), region = 73 }

// kernel: bert_forward.12
= control target key start
LH: loop header
LB: loop body
LE: loop exit
PB: predicated region body
PF: predicated region fallthrough
CT: control target
= control target key end

     0   :  { %vm19_vm0 = vcmask 523264   ;;  %v130_v1 = vmov 0.0   ;;  %vm47_vm1 = vcmask 261120   ;;  %vm101_vm2 = vcmask 519168   ;;  %s173_s1 = inlined_call_operand.vmem [shape: bf16[32,64], index: 1, kind: input, shape index: {}]   ;;  %s174_s2 = inlined_call_operand.vmem [shape: f32[1,64], index: 2, kind: input, shape index: {}]   ;;  %s175_s0 = inlined_call_operand.vmem [shape: bf16[16,32], index: 0, kind: input, shape index: {}]   ;;  %s176_s3 = inlined_call_operand.vmem [shape: bf16[16,64], index: 3, kind: output, shape index: {}]  }
   0x1   :  { %v123_v0 = vld [vmem:[%s173_s1 + $0x8] sm:$0xff]  ;;  %20 = vst.msk [vmem:[#allocation2] sm:$0xff] %vm19_vm0, %v130_v1  ;;  %v122_v2 = vld [vmem:[%s173_s1] sm:$0xff] }
   0x2   :  { %21 = vst.msk [vmem:[#allocation2 + $0x8] sm:$0xff] %vm19_vm0, %v130_v1  ;;  %57 = vmatpush.bf16.msra.mxu0 %v123_v0  ;;  %v121_v3 = vld [vmem:[%s175_s0] sm:$0xff] }
   0x3   :  { %v125_v8 = vld [vmem:[%s174_s2] ss:$0 sm:$0xff] }
   0x6   :  { %58 = vmatpush.bf16.msra.mxu0 %v122_v2 }
   0x8   :  { %v22_v4 = vld [vmem:[#allocation2] sm:$0xff] }
   0x9   :  { %120 = vmatmul.msk.bf16.vlgmr.msra.gmra.mxu0 %vm47_vm1, %v121_v3  ;;  %v23_v7 = vld [vmem:[#allocation2 + $0x8] sm:$0xff] }
  0x86   :  { %v60_v5 = vpop.f32.mrf.mxu0 }
  0x87   :  { %v65_v6 = vadd.f32 %v60_v5, %v22_v4 }
  0x89   :  { %68 = vst.msk [vmem:[#allocation2] sm:$0xff] %vm19_vm0, %v65_v6 }
  0x8e   :  { %v62_v9 = vpop.f32.mrf.mxu0 }
  0x8f   :  { %v66_v10 = vadd.f32 %v62_v9, %v23_v7 }
  0x90   :  { %v73_v11 = vld [vmem:[#allocation2] sm:$0xff] }
  0x91   :  { %v79_v12 = vadd.f32 %v125_v8, %v73_v11  ;;  %69 = vst.msk [vmem:[#allocation2 + $0x8] sm:$0xff] %vm19_vm0, %v66_v10 }
  0x93   :  { %v83_v13 = vmul.f32 0.044715, %v79_v12  ;;  %v81_v26 = vmul.f32 0.5, %v79_v12 }
  0x95   :  { %v85_v14 = vmul.f32 %v83_v13, %v79_v12 }
  0x97   :  { %v87_v15 = vmul.f32 %v85_v14, %v79_v12 }
  0x98   :  { %v74_v16 = vld [vmem:[#allocation2 + $0x8] sm:$0xff] }
  0x99   :  { %v89_v17 = vadd.f32 %v87_v15, %v79_v12  ;;  %v80_v18 = vadd.f32 %v125_v8, %v74_v16 }
  0x9b   :  { %v91_v19 = vmul.f32 0.7978846, %v89_v17  ;;  %v84_v20 = vmul.f32 0.044715, %v80_v18  ;;  %v82_v31 = vmul.f32 0.5, %v80_v18 }
  0x9d   :  { %126 = vtanh.f32 %v91_v19  ;;  %v86_v21 = vmul.f32 %v84_v20, %v80_v18 }
  0x9f   :  { %v88_v22 = vmul.f32 %v86_v21, %v80_v18 }
  0xa1   :  { %v90_v23 = vadd.f32 %v88_v22, %v80_v18 }
  0xa3   :  { %v127_v24 = vpop.eup %126  ;;  %v92_v25 = vmul.f32 0.7978846, %v90_v23 }
  0xa4   :  { %v95_v27 = vadd.f32 1.0, %v127_v24 }
  0xa5   :  { %128 = vtanh.f32 %v92_v25 }
  0xa6   :  { %v97_v28 = vmul.f32 %v95_v27, %v81_v26 }
  0xa8   :  { %v99_v29 = vpack.c.bf16 %v97_v28, %v97_v28 }
  0xaa   :  { %102 = vst.msk [vmem:[%s176_s3] sm:$0xf] %vm101_vm2, %v99_v29 }
  0xab   :  { %v129_v30 = vpop.eup %128 }
  0xac   :  { %v96_v32 = vadd.f32 1.0, %v129_v30 }
  0xae   :  { %v98_v33 = vmul.f32 %v96_v32, %v82_v31 }
  0xb0   :  { %v100_v34 = vpack.c.bf16 %v98_v33, %v98_v33 }
  0xb2   :  { %103 = vst.msk [vmem:[%s176_s3 + $0x4] sm:$0xf] %vm101_vm2, %v100_v34 }

// kernel: bert_forward.11
= control target key start
LH: loop header
LB: loop body
LE: loop exit
PB: predicated region body
PF: predicated region fallthrough
CT: control target
= control target key end

     0   :  { %s856_s24 = smov 0   ;;  %s944_s0 = inlined_call_operand.vmem [shape: bf16[2,8,96], index: 0, kind: input, shape index: {}]   ;;  %s945_s1 = inlined_call_operand.vmem [shape: s32[2,1,8], index: 1, kind: input, shape index: {}]   ;;  %s946_s2 = inlined_call_operand.vmem [shape: bf16[32,32], index: 2, kind: input, shape index: {}]   ;;  %s947_s3 = inlined_call_operand.vmem [shape: f32[1,32], index: 3, kind: input, shape index: {}]   ;;  %s948_s4 = inlined_call_operand.vmem [shape: bf16[2,8,32], index: 4, kind: input, shape index: {}]   ;;  %s949_s5 = inlined_call_operand.vmem [shape: f32[1,32], index: 5, kind: input, shape index: {}]   ;;  %s950_s6 = inlined_call_operand.vmem [shape: f32[1,32], index: 6, kind: input, shape index: {}]   ;;  %s951_s7 = inlined_call_operand.vmem [shape: bf16[2,8,32], index: 7, kind: output, shape index: {}]  }
   0x1 LB: > { %s718_s25 = sadd.s32 4294967295, %s799_s24   ;;  %p722_p0 = scmp.ge.s32.totalorder %s799_s24, 1  ;;  %s799_s24 = sphi %s856_s24, %s17_s24  }
   0x2   : > { %p253_p1 = scmp.lt.s32.totalorder %s799_s24, 3 }
   0x4   : > { %p254_p2 = pnand %p722_p0, %p253_p1 }
   0x5   : > { %p290_p3 = scmp.lt.s32.totalorder (!%p254_p2), %s718_s25, 1  ;;  %s801_s30 = smov (!%p254_p2), 96  }
   0x6   : > { %257 = sbr.rel (%p254_p2) target bundleno = 1604 (0x644), region = 48  ;;  %s802_s8 = smov (!%p254_p2), 88  }
   0x7   : > { %s803_s9 = smov (!%p254_p2), 120   ;;  %s804_s10 = smov (!%p254_p2), 64  }
   0x8   : > { %s805_s11 = smov (!%p254_p2), 80   ;;  %s806_s12 = smov (!%p254_p2), 72  }
   0x9   : > { %s807_s13 = smov (!%p254_p2), 112   ;;  %s808_s14 = smov (!%p254_p2), 104  }
   0xa   : > { %s809_s18 = smov (!%p254_p2), 56   ;;  %s810_s19 = smov (!%p254_p2), 40  }
   0xb   : > { %s953_s25 = smov (!%p290_p3, %s718_s25), 1  ;;  %vm319_vm0 = vcmask 64512   ;;  %vm356_vm1 = vcmask 1043456   ;;  %s811_s20 = smov 48   ;;  %vm434_vm2 = vcmask 130112   ;;  %vm496_vm3 = vcmask 195712  }
   0xc   : > { %s867_s26 = sshll.u32 %s953_s25, 2  ;;  %s296_s17 = scalar_lea.vmem %s945_s1, %s953_s25  ;;  %vm558_vm4 = vcmask 261312   ;;  %vm582_vm5 = vcmask 261120   ;;  %vm642_vm10 = vcmask 257024  }
   0xd   : > { %s293_s29 = scalar_lea.vmem %s944_s0, %s867_s26  ;;  %v307_v7 = vld [vmem:[%s296_s17] sm:$0x1]  ;;  %s812_s21 = smov 8  }
   0xe   : > { %v306_v0 = vld [vmem:[%s293_s29] sm:$0xf]  ;;  %v308_v9 = vcvt.s32.f32 %v307_v7  ;;  %s813_s22 = smov 16   ;;  %s814_s23 = smov 24  }
   0xf   : > { %v315_v1 = vunpack.c.l.b16 %v306_v0 }
  0x10   : > { %v309_v10 = vsub.f32 1.0, %v308_v9 }
  0x11   : > { %v873_v2 = vpack.c.b16 %v315_v1, %v315_v1 }
  0x12   : > { %v310_v11 = vmul.f32 -10000.0, %v309_v10 }
  0x13   : > { %317 = vrot.lane.b32.xlu0 %v873_v2, %s801_s30  ;;  %376 = vrot.lane.b32.xlu1 %v873_v2, %s802_s8 }
  0x14   : > { %374 = vrot.lane.b32.xlu2 %v873_v2, %s803_s9  ;;  %v312_v12 = vperm.slane %v310_v11, 0  ;;  %s300_s9 = scalar_lea.vmem %s948_s4, %s867_s26 }
  0x1c   : > { %351 = vrot.lane.b32.xlu2 %v873_v2, %s804_s10 }
  0x24   : > { %438 = vrot.lane.b32.xlu2 %v873_v2, %s805_s11 }
  0x2c   : > { %500 = vrot.lane.b32.xlu2 %v873_v2, %s806_s12 }
  0x34   : > { %436 = vrot.lane.b32.xlu2 %v873_v2, %s807_s13 }
  0x3c   : > { %498 = vrot.lane.b32.xlu2 %v873_v2, %s808_s14 }
  0x6e   : > { %v375_v8 = vpop.permute.xlu2 %374 }
  0x76   : > { %v352_v17 = vpop.permute.xlu2 %351 }
  0x77   : > { %v358_v22 = vsel %vm356_vm1, %v352_v17, 0 }
  0x78   : > { %367 = vmatpush.bf16.msra.mxu1 %v358_v22 }
  0x7e   : > { %v439_v18 = vpop.permute.xlu2 %438 }
  0x7f   : > { %v444_v20 = vsel %vm319_vm0, %v439_v18, 0 }
  0x80   : > { %453 = vmatpush.bf16.xpose.msrb.mxu1 %v444_v20 }
  0x85   : > { %v318_v3 = vpop.permute.xlu0 %317  ;;  %v377_v5 = vpop.permute.xlu1 %376 }
  0x86   : > { %v324_v4 = vsel %vm319_vm0, %v318_v3, 0  ;;  %v382_v6 = vsel %vm319_vm0, %v377_v5, 0  ;;  %v501_v19 = vpop.permute.xlu2 %500 }
  0x87   : > { %333 = vmatpush.bf16.xpose.msra.mxu0 %v324_v4  ;;  %391 = vmatpush.bf16.xpose.msra.mxu2 %v382_v6  ;;  %v506_v21 = vsel %vm319_vm0, %v501_v19, 0 }
  0x8e   : > { %726 = vmatmul.msk.bf16.vlgmr.msra.gmra.mxu0 %vm319_vm0, %v306_v0  ;;  %728 = vmatmul.msk.bf16.vlgmr.msra.gmra.mxu2 %vm319_vm0, %v375_v8  ;;  %v437_v23 = vpop.permute.xlu2 %436 }
  0x8f   : > { %515 = vmatpush.bf16.xpose.msrb.mxu0 %v506_v21 }
  0x96   : > { %v499_v24 = vpop.permute.xlu2 %498 }
  0x9e   : > { %732 = vmatmul.msk.bf16.vlgmr.msrb.gmra.mxu0 %vm319_vm0, %v499_v24  ;;  %v746_v24 = vld [vmem:[%s946_s2 + $0x8] sm:$0xff] }
 0x10b   : > { %v335_v13 = vpop.f32.mrf.mxu0 }
 0x10c   : > { %v336_v14 = vadd.f32 %v335_v13, %v312_v12 }
 0x10e   : > { %v339_v15 = vsel %vm319_vm0, %v336_v14, -inf }
 0x10f   : > { %340 = vmax.xlane.f32.xlu0 %v339_v15 }
 0x111   : > { %v393_v25 = vpop.f32.mrf.mxu2 }
 0x112   : > { %v394_v26 = vadd.f32 %v393_v25, %v312_v12  ;;  %v745_v25 = vld [vmem:[%s946_s2] sm:$0xff] }
 0x113   : > { %v337_v16 = vpop.f32.mrf.mxu0 }
 0x114   : > { %v397_v28 = vsel %vm319_vm0, %v394_v26, -inf }
 0x115   : > { %398 = vmax.xlane.f32.xlu2 %v397_v28 }
 0x119   : > { %v395_v31 = vpop.f32.mrf.mxu2 }
 0x11a   : > { %v770_v31 = vld [vmem:[%s947_s3] ss:$0 sm:$0xff] }
 0x11b   : > { %v517_v34 = vpop.f32.mrf.mxu0 }
 0x11c   : > { %v518_v35 = vadd.f32 %v517_v34, %v312_v12 }
 0x11e   : > { %v521_v36 = vsel %vm319_vm0, %v518_v35, -inf }
 0x123   : > { %v519_v38 = vpop.f32.mrf.mxu0 }
 0x124   : > { %v815_v38 = vmov 32.0  }
 0x182   : > { %v341_v27 = vpop.xlane.xlu0 %340 }
 0x183   : > { %v342_v29 = vsub.f32 %v336_v14, %v341_v27 }
 0x185   : > { %v343_v30 = vmul.f32 1.442695, %v342_v29 }
 0x187   : > { %773 = vpow2.f32 %v343_v30  ;;  %v599_v30 = vld [vmem:[%s300_s9] sm:$0xf] }
 0x188   : > { %v399_v43 = vpop.xlane.xlu2 %398 }
 0x189   : > { %v400_v45 = vsub.f32 %v394_v26, %v399_v43 }
 0x18b   : > { %v401_v46 = vmul.f32 1.442695, %v400_v45 }
 0x18d   : > { %v774_v32 = vpop.eup %773 }
 0x18e   : > { %v345_v33 = vsel %vm319_vm0, %v774_v32, 0.0 }
 0x18f   : > { %346 = vadd.xlane.f32.xlu1 %v345_v33 }
 0x197   : > { %522 = vmax.xlane.f32.xlu1 %v521_v36 }
 0x1b0   : > { %409 = vrot.lane.b32.xlu1 %v873_v2, %s809_s18  ;;  %s304_s18 = scalar_lea.vmem %s951_s7, %s867_s26 }
 0x1b8   : > { %533 = vrot.lane.b32.xlu1 %v873_v2, %s810_s19 }
 0x202   : > { %v347_v37 = vpop.xlane.xlu1 %346 }
 0x203   : > { %775 = vrcp.f32 %v347_v37 }
 0x204   : > { %777 = vpow2.f32 %v401_v46 }
 0x209   : > { %v776_v39 = vpop.eup %775 }
 0x20a   : > { %v349_v40 = vmul.f32 %v776_v39, %v774_v32  ;;  %v523_v47 = vpop.xlane.xlu1 %522  ;;  %v778_v53 = vpop.eup %777  ;;  %v600_v32 = vunpack.c.l.bf16 %v599_v30 }
 0x20b   : > { %v524_v50 = vsub.f32 %v518_v35, %v523_v47  ;;  %v403_v55 = vsel %vm319_vm0, %v778_v53, 0.0 }
 0x20c   : > { %v350_v41 = vpack.c.bf16 %v349_v40, %v349_v40 }
 0x20d   : > { %v525_v52 = vmul.f32 1.442695, %v524_v50 }
 0x20e   : > { %727 = vmatmul.msk.bf16.vlgmr.msra.gmra.mxu1 %vm319_vm0, %v350_v41 }
 0x20f   : > { %779 = vpow2.f32 %v525_v52  ;;  %592 = vmatpush.bf16.msra.mxu1 %v746_v24 }
 0x213   : > { %593 = vmatpush.bf16.msra.mxu1 %v745_v25 }
 0x215   : > { %v780_v56 = vpop.eup %779 }
 0x216   : > { %v527_v57 = vsel %vm319_vm0, %v780_v56, 0.0 }
 0x21e   : > { %730 = vmatmul.msk.bf16.vlgmr.msrb.gmra.mxu1 %vm319_vm0, %v437_v23 }
 0x222   : > { %v410_v58 = vpop.permute.xlu1 %409 }
 0x223   : > { %v415_v59 = vsel %vm356_vm1, %v410_v58, 0 }
 0x224   : > { %424 = vmatpush.bf16.msra.mxu3 %v415_v59  ;;  %v771_v59 = vld [vmem:[%s949_s5] ss:$0 sm:$0xff] }
 0x22a   : > { %v534_v60 = vpop.permute.xlu1 %533 }
 0x22b   : > { %v539_v61 = vsel %vm356_vm1, %v534_v60, 0 }
 0x22c   : > { %548 = vmatpush.bf16.msrb.mxu2 %v539_v61  ;;  %v772_v61 = vld [vmem:[%s950_s6] ss:$0 sm:$0xff] }
 0x28b   : > { %v369_v42 = vpop.f32.mrf.mxu1 }
 0x28c   : > { %373 = vst.msk [vmem:[#allocation2] sm:$0xff] %vm319_vm0, %v369_v42 }
 0x293   : > { %v371_v44 = vpop.f32.mrf.mxu1 }
 0x29b   : > { %v455_v48 = vpop.f32.mrf.mxu1 }
 0x29c   : > { %v456_v49 = vadd.f32 %v455_v48, %v312_v12 }
 0x29e   : > { %v459_v51 = vsel %vm319_vm0, %v456_v49, -inf }
 0x29f   : > { %460 = vmax.xlane.f32.xlu0 %v459_v51 }
 0x2a3   : > { %v457_v54 = vpop.f32.mrf.mxu1 }
 0x2a7   : > { %404 = vadd.xlane.f32.xlu0 %v403_v55 }
 0x2af   : > { %528 = vadd.xlane.f32.xlu0 %v527_v57 }
 0x312   : > { %v461_v62 = vpop.xlane.xlu0 %460 }
 0x313   : > { %v462_v63 = vsub.f32 %v456_v49, %v461_v62 }
 0x315   : > { %v463_v0 = vmul.f32 1.442695, %v462_v63 }
 0x317   : > { %781 = vpow2.f32 %v463_v0 }
 0x31a   : > { %v405_v1 = vpop.xlane.xlu0 %404 }
 0x31b   : > { %783 = vrcp.f32 %v405_v1 }
 0x31d   : > { %v782_v3 = vpop.eup %781 }
 0x31e   : > { %v465_v4 = vsel %vm319_vm0, %v782_v3, 0.0 }
 0x31f   : > { %466 = vadd.xlane.f32.xlu0 %v465_v4 }
 0x321   : > { %v784_v5 = vpop.eup %783 }
 0x322   : > { %v529_v6 = vpop.xlane.xlu0 %528  ;;  %v407_v7 = vmul.f32 %v784_v5, %v778_v53 }
 0x323   : > { %785 = vrcp.f32 %v529_v6 }
 0x324   : > { %v408_v8 = vpack.c.bf16 %v407_v7, %v407_v7 }
 0x326   : > { %729 = vmatmul.msk.bf16.vlgmr.msra.gmra.mxu3 %vm319_vm0, %v408_v8 }
 0x329   : > { %v786_v9 = vpop.eup %785 }
 0x32a   : > { %v531_v10 = vmul.f32 %v786_v9, %v780_v56 }
 0x32c   : > { %v532_v11 = vpack.c.bf16 %v531_v10, %v531_v10 }
 0x32e   : > { %733 = vmatmul.msk.bf16.vlgmr.msrb.gmra.mxu2 %vm319_vm0, %v532_v11 }
 0x333   : > { %471 = vrot.lane.b32.xlu0 %v873_v2, %s811_s20 }
 0x392   : > { %v467_v12 = vpop.xlane.xlu0 %466 }
 0x393   : > { %787 = vrcp.f32 %v467_v12 }
 0x394   : > { %789 = vrcp.f32 %v815_v38 }
 0x399   : > { %v788_v13 = vpop.eup %787 }
 0x39a   : > { %v469_v14 = vmul.f32 %v788_v13, %v782_v3  ;;  %v790_v39 = vpop.eup %789 }
 0x39b   : > { %v606_v40 = vmul.f32 32.0, %v790_v39  ;;  %vm610_vm6 = vweird.f32 %v790_v39 }
 0x39c   : > { %v470_v17 = vpack.c.bf16 %v469_v14, %v469_v14 }
 0x39d   : > { %v607_v41 = vsub.f32 1.0, %v606_v40 }
 0x39f   : > { %v608_v42 = vmul.f32 %v790_v39, %v607_v41 }
 0x3a1   : > { %v609_v43 = vadd.f32 %v790_v39, %v608_v42 }
 0x3a3   : > { %v611_v44 = vsel %vm610_vm6, %v790_v39, %v609_v43 }
 0x3a5   : > { %v472_v15 = vpop.permute.xlu0 %471 }
 0x3a6   : > { %v477_v16 = vsel %vm356_vm1, %v472_v15, 0 }
 0x3a7   : > { %486 = vmatpush.bf16.msrb.mxu3 %v477_v16 }
 0x3a9   : > { %v426_v18 = vpop.f32.mrf.mxu3 }
 0x3aa   : > { %731 = vmatmul.msk.bf16.vlgmr.msrb.gmra.mxu3 %vm319_vm0, %v470_v17  ;;  %431 = vrot.lane.b32.xlu2 %v426_v18, %s812_s21 }
 0x3b1   : > { %v428_v19 = vpop.f32.mrf.mxu3  ;;  %v550_v20 = vpop.f32.mrf.mxu2 }
 0x3b9   : > { %v552_v21 = vpop.f32.mrf.mxu2 }
 0x404   : > { %v432_v22 = vpop.permute.xlu2 %431 }
 0x405   : > { %435 = vst.msk [vmem:[#allocation2] sm:$0xff] %vm434_vm2, %v432_v22 }
 0x42d   : > { %v488_v2 = vpop.f32.mrf.mxu3 }
 0x42e   : > { %493 = vrot.lane.b32.xlu1 %v488_v2, %s813_s22 }
 0x435   : > { %v490_v23 = vpop.f32.mrf.mxu3 }
 0x436   : > { %555 = vrot.lane.b32.xlu1 %v550_v20, %s814_s23 }
 0x4a0   : > { %v494_v26 = vpop.permute.xlu1 %493 }
 0x4a1   : > { %497 = vst.msk [vmem:[#allocation2] sm:$0xff] %vm496_vm3, %v494_v26 }
 0x4a8   : > { %v556_v27 = vpop.permute.xlu1 %555 }
 0x4a9   : > { %559 = vst.msk [vmem:[#allocation2] sm:$0xff] %vm558_vm4, %v556_v27 }
 0x4b0   : > { %v560_v28 = vld [vmem:[#allocation2] sm:$0xff] }
 0x4b1   : > { %v561_v29 = vpack.c.bf16 %v560_v28, %v560_v28 }
 0x4b3   : > { %742 = vmatmul.msk.bf16.vlgmr.msra.gmra.mxu1 %vm582_vm5, %v561_v29 }
 0x530   : > { %v595_v33 = vpop.f32.mrf.mxu1 }
 0x531   : > { %v596_v34 = vadd.f32 %v770_v31, %v595_v33 }
 0x533   : > { %v601_v35 = vadd.f32 %v600_v32, %v596_v34 }
 0x535   : > { %v602_v36 = vsel %vm582_vm5, %v601_v35, 0.0 }
 0x536   : > { %603 = vadd.xlane.f32.xlu0 %v602_v36 }
 0x538   : > { %v597_v37 = vpop.f32.mrf.mxu1 }
 0x5a9   : > { %v604_v45 = vpop.xlane.xlu0 %603 }
 0x5aa   : > { %v612_v46 = vmul.f32 %v611_v44, %v604_v45 }
 0x5ac   : > { %v613_v47 = vsub.f32 %v601_v35, %v612_v46 }
 0x5ae   : > { %v614_v48 = vmul.f32 %v613_v47, %v613_v47 }
 0x5b0   : > { %v615_v49 = vsel %vm582_vm5, %v614_v48, 0.0 }
 0x5b1   : > { %616 = vadd.xlane.f32.xlu1 %v615_v49 }
 0x624   : > { %v617_v50 = vpop.xlane.xlu1 %616 }
 0x625   : > { %v618_v51 = vmul.f32 %v617_v50, %v611_v44 }
 0x627   : > { %v619_v52 = vadd.f32 1e-12, %v618_v51 }
 0x629   : > { %791 = vrsqrt.f32 %v619_v52  ;;  %vm626_vm8 = vweird.f32 %v619_v52 }
 0x62f   : > { %v792_v53 = vpop.eup %791 }
 0x630   : > { %v621_v54 = vmul.f32 %v792_v53, %v619_v52  ;;  %vm627_vm7 = vweird.f32 %v792_v53 }
 0x631   : > { %vm628_vm9 = vmor %vm626_vm8, %vm627_vm7 }
 0x632   : > { %v622_v55 = vmul.f32 %v792_v53, %v621_v54 }
 0x634   : > { %v623_v56 = vmul.f32 0.5, %v622_v55 }
 0x636   : > { %v624_v57 = vsub.f32 1.5, %v623_v56 }
 0x638   : > { %v625_v58 = vmul.f32 %v792_v53, %v624_v57 }
 0x63a   : > { %v629_v60 = vsel %vm628_vm9, %v792_v53, %v625_v58 }
 0x63b   : > { %v630_v62 = vmul.f32 %v629_v60, %v613_v47 }
 0x63d   : > { %v635_v63 = vmul.f32 %v771_v59, %v630_v62 }
 0x63f   : > { %v640_v0 = vadd.f32 %v772_v61, %v635_v63 }
 0x641   : > { %v641_v1 = vpack.c.bf16 %v640_v0, %v640_v0 }
 0x643   : > { %643 = vst.msk [vmem:[%s304_s18] sm:$0xf] %vm642_vm10, %v641_v1 }
 0x644 PF: > { %s17_s24 = sadd.s32 1, %s799_s24  }
 0x645   : > { %p14_p4 = scmp.ge.s32.totalorder %s17_s24, 4  }
 0x647   :  { %16 = sbr.rel (!%p14_p4) target bundleno = 1 (0x1), region = 84 }

// kernel: bert_forward.13
= control target key start
LH: loop header
LB: loop body
LE: loop exit
PB: predicated region body
PF: predicated region fallthrough
CT: control target
= control target key end

     0   :  { %vm28_vm0 = vcmask 261120   ;;  %v225_v1 = vmov 0.0   ;;  %vm72_vm1 = vcmask 523264   ;;  %v226_v24 = vmov 32.0   ;;  %s303_s1 = inlined_call_operand.vmem [shape: bf16[64,32], index: 1, kind: input, shape index: {}]   ;;  %s304_s0 = inlined_call_operand.vmem [shape: bf16[16,64], index: 0, kind: input, shape index: {}]   ;;  %s305_s2 = inlined_call_operand.vmem [shape: f32[1,32], index: 2, kind: input, shape index: {}]   ;;  %s306_s3 = inlined_call_operand.vmem [shape: bf16[16,32], index: 3, kind: input, shape index: {}]   ;;  %s307_s4 = inlined_call_operand.vmem [shape: f32[1,32], index: 4, kind: input, shape index: {}]   ;;  %s308_s5 = inlined_call_operand.vmem [shape: f32[1,32], index: 5, kind: input, shape index: {}]   ;;  %s309_s6 = inlined_call_operand.vmem [shape: bf16[16,32], index: 6, kind: output, shape index: {}]  }
   0x1   :  { %v209_v0 = vld [vmem:[%s303_s1 + $0x18] sm:$0xff]  ;;  %29 = vst.msk [vmem:[#allocation2] sm:$0xff] %vm28_vm0, %v225_v1  ;;  %v208_v2 = vld [vmem:[%s303_s1 + $0x10] sm:$0xff]  ;;  %v207_v3 = vld [vmem:[%s303_s1 + $0x8] sm:$0xff]  ;;  %219 = vrcp.f32 %v226_v24  ;;  %vm177_vm7 = vcmask 257024  }
   0x2   :  { %30 = vst.msk [vmem:[#allocation2 + $0x8] sm:$0xff] %vm28_vm0, %v225_v1  ;;  %80 = vmatpush.bf16.msra.mxu0 %v209_v0  ;;  %v206_v4 = vld [vmem:[%s303_s1] sm:$0xff] }
   0x3   :  { %v205_v5 = vld [vmem:[%s304_s0] sm:$0xff] }
   0x4   :  { %v211_v10 = vld [vmem:[%s306_s3] sm:$0xff]  }
   0x5   :  { %v216_v11 = vld [vmem:[%s305_s2] ss:$0 sm:$0xff]  ;;  %v212_v14 = vunpack.c.l.bf16 %v211_v10  ;;  %v213_v19 = vunpack.c.h.bf16 %v211_v10 }
   0x6   :  { %81 = vmatpush.bf16.msra.mxu0 %v208_v2  ;;  %v217_v55 = vld [vmem:[%s307_s4] ss:$0 sm:$0xff] }
   0x7   :  { %v220_v25 = vpop.eup %219  ;;  %v218_v58 = vld [vmem:[%s308_s5] ss:$0 sm:$0xff] }
   0x8   :  { %v31_v6 = vld [vmem:[#allocation2] sm:$0xff]  ;;  %v119_v26 = vmul.f32 32.0, %v220_v25  ;;  %vm123_vm2 = vweird.f32 %v220_v25 }
   0x9   :  { %v32_v9 = vld [vmem:[#allocation2 + $0x8] sm:$0xff] }
   0xa   :  { %82 = vmatpush.bf16.msra.mxu0 %v207_v3  ;;  %v120_v27 = vsub.f32 1.0, %v119_v26 }
   0xc   :  { %v121_v28 = vmul.f32 %v220_v25, %v120_v27 }
   0xe   :  { %83 = vmatpush.bf16.msra.mxu0 %v206_v4  ;;  %v122_v29 = vadd.f32 %v220_v25, %v121_v28 }
  0x10   :  { %v124_v30 = vsel %vm123_vm2, %v220_v25, %v122_v29 }
  0x11   :  { %204 = vmatmul.msk.bf16.vlgmr.msra.gmra.mxu0 %vm72_vm1, %v205_v5 }
  0x8e   :  { %v85_v7 = vpop.f32.mrf.mxu0 }
  0x8f   :  { %v90_v8 = vadd.f32 %v85_v7, %v31_v6 }
  0x91   :  { %93 = vst.msk [vmem:[#allocation2] sm:$0xff] %vm28_vm0, %v90_v8 }
  0x96   :  { %v87_v12 = vpop.f32.mrf.mxu0 }
  0x97   :  { %v91_v13 = vadd.f32 %v87_v12, %v32_v9 }
  0x98   :  { %v98_v15 = vld [vmem:[#allocation2] sm:$0xff] }
  0x99   :  { %94 = vst.msk [vmem:[#allocation2 + $0x8] sm:$0xff] %vm28_vm0, %v91_v13  ;;  %v104_v16 = vadd.f32 %v216_v11, %v98_v15 }
  0x9b   :  { %v110_v17 = vadd.f32 %v212_v14, %v104_v16 }
  0x9d   :  { %v112_v18 = vsel %vm28_vm0, %v110_v17, 0.0 }
  0x9e   :  { %113 = vadd.xlane.f32.xlu0 %v112_v18 }
  0xa0   :  { %v99_v20 = vld [vmem:[#allocation2 + $0x8] sm:$0xff] }
  0xa1   :  { %v105_v21 = vadd.f32 %v216_v11, %v99_v20 }
  0xa3   :  { %v111_v22 = vadd.f32 %v213_v19, %v105_v21 }
  0xa5   :  { %v115_v23 = vsel %vm28_vm0, %v111_v22, 0.0 }
  0xa6   :  { %116 = vadd.xlane.f32.xlu0 %v115_v23 }
 0x111   :  { %v114_v31 = vpop.xlane.xlu0 %113 }
 0x112   :  { %v125_v32 = vmul.f32 %v124_v30, %v114_v31 }
 0x114   :  { %v127_v33 = vsub.f32 %v110_v17, %v125_v32 }
 0x116   :  { %v129_v34 = vmul.f32 %v127_v33, %v127_v33 }
 0x118   :  { %v131_v35 = vsel %vm28_vm0, %v129_v34, 0.0 }
 0x119   :  { %132 = vadd.xlane.f32.xlu1 %v131_v35  ;;  %v117_v36 = vpop.xlane.xlu0 %116 }
 0x11a   :  { %v126_v37 = vmul.f32 %v124_v30, %v117_v36 }
 0x11c   :  { %v128_v38 = vsub.f32 %v111_v22, %v126_v37 }
 0x11e   :  { %v130_v39 = vmul.f32 %v128_v38, %v128_v38 }
 0x120   :  { %v134_v40 = vsel %vm28_vm0, %v130_v39, 0.0 }
 0x121   :  { %135 = vadd.xlane.f32.xlu1 %v134_v40 }
 0x18c   :  { %v133_v41 = vpop.xlane.xlu1 %132 }
 0x18d   :  { %v137_v42 = vmul.f32 %v133_v41, %v124_v30 }
 0x18f   :  { %v139_v43 = vadd.f32 1e-12, %v137_v42 }
 0x191   :  { %221 = vrsqrt.f32 %v139_v43  ;;  %vm147_vm4 = vweird.f32 %v139_v43 }
 0x194   :  { %v136_v44 = vpop.xlane.xlu1 %135 }
 0x195   :  { %v138_v45 = vmul.f32 %v136_v44, %v124_v30 }
 0x197   :  { %v222_v46 = vpop.eup %221  ;;  %v140_v47 = vadd.f32 1e-12, %v138_v45 }
 0x198   :  { %v142_v48 = vmul.f32 %v222_v46, %v139_v43  ;;  %vm148_vm3 = vweird.f32 %v222_v46 }
 0x199   :  { %223 = vrsqrt.f32 %v140_v47  ;;  %vm149_vm5 = vmor %vm147_vm4, %vm148_vm3  ;;  %vm157_vm8 = vweird.f32 %v140_v47 }
 0x19a   :  { %v143_v49 = vmul.f32 %v222_v46, %v142_v48 }
 0x19c   :  { %v144_v50 = vmul.f32 0.5, %v143_v49 }
 0x19e   :  { %v145_v51 = vsub.f32 1.5, %v144_v50 }
 0x19f   :  { %v224_v52 = vpop.eup %223 }
 0x1a0   :  { %v146_v53 = vmul.f32 %v222_v46, %v145_v51  ;;  %v152_v54 = vmul.f32 %v224_v52, %v140_v47  ;;  %vm158_vm6 = vweird.f32 %v224_v52 }
 0x1a1   :  { %vm159_vm9 = vmor %vm157_vm8, %vm158_vm6 }
 0x1a2   :  { %v150_v56 = vsel %vm149_vm5, %v222_v46, %v146_v53  ;;  %v153_v57 = vmul.f32 %v224_v52, %v152_v54 }
 0x1a3   :  { %v161_v59 = vmul.f32 %v150_v56, %v127_v33 }
 0x1a4   :  { %v154_v60 = vmul.f32 0.5, %v153_v57 }
 0x1a5   :  { %v167_v61 = vmul.f32 %v217_v55, %v161_v59 }
 0x1a6   :  { %v155_v62 = vsub.f32 1.5, %v154_v60 }
 0x1a7   :  { %v173_v63 = vadd.f32 %v218_v58, %v167_v61 }
 0x1a8   :  { %v156_v0 = vmul.f32 %v224_v52, %v155_v62 }
 0x1a9   :  { %v175_v1 = vpack.c.bf16 %v173_v63, %v173_v63 }
 0x1aa   :  { %v160_v2 = vsel %vm159_vm9, %v224_v52, %v156_v0 }
 0x1ab   :  { %178 = vst.msk [vmem:[%s309_s6] sm:$0xf] %vm177_vm7, %v175_v1  ;;  %v162_v3 = vmul.f32 %v160_v2, %v128_v38 }
 0x1ad   :  { %v168_v4 = vmul.f32 %v217_v55, %v162_v3 }
 0x1af   :  { %v174_v5 = vadd.f32 %v218_v58, %v168_v4 }
 0x1b1   :  { %v176_v6 = vpack.c.bf16 %v174_v5, %v174_v5 }
 0x1b3   :  { %179 = vst.msk [vmem:[%s309_s6 + $0x4] sm:$0xf] %vm177_vm7, %v176_v6 }

</bundles_post_ra>
